<compile_context>
chip_gen: v5e
topology: v5e:2x2
jax: 0.10.0
libtpu: 0.0.40
codegen_flags: <defaults>
</compile_context>

<pallas_src>
import functools

import jax
import jax.numpy as jnp
from jax.experimental import pallas as pl
from jax.experimental.pallas import tpu as pltpu


def _conv_gate_kernel(x_ref, w_ref, o_ref, *, K, stride, H_out, W_out):
    """Implicit-GEMM conv with the orientation gate pre-folded into the weight.

    x_ref: (1, H_p, W_p, C_in)         zero-padded NHWC input (halo included)
    w_ref: (C_in*K*K, C_out_pad)       gated, lane-padded weight matrix
    o_ref: (1, H_out*W_out, C_out_pad) lane-dense output tile
    """
    cols = []
    for kh in range(K):
        for kw in range(K):
            h_hi = kh + (H_out - 1) * stride + 1
            w_hi = kw + (W_out - 1) * stride + 1
            if stride == 1:
                xs = x_ref[0, kh:h_hi, kw:w_hi, :]            # (H_out, W_out, C_in)
            else:
                # TODO(synk): strided patch gather is only traced when stride>1
                # (FashionMNIST stack uses stride=1); validate before relying on it.
                xs = x_ref[0, kh:h_hi:stride, kw:w_hi:stride, :]
            cols.append(xs)
    # In-VMEM im2col: (H_out, W_out, C_in*K*K) -> (M_tile, Kc)
    patches = jnp.concatenate(cols, axis=-1)
    patches = patches.reshape(H_out * W_out, patches.shape[-1])
    # Single MXU matmul over the full Kc contraction; f32 accumulate.
    acc = jnp.dot(patches, w_ref[...], preferred_element_type=jnp.float32)
    o_ref[0] = acc.astype(o_ref.dtype)


@functools.partial(jax.jit, static_argnames=("stride", "padding"))
def partial_r2_conv(x, weight, alpha_logits, *, stride=1, padding=0):
    """Forward pass of PartialR2Conv.

    x:            (N, C_in, H, W)      NCHW input
    weight:       (C_out, C_in, K, K)  expanded R2Conv filter (OIHW)
    alpha_logits: (gsize,)             OrientationGate logits
    """
    N, C_in, H, W = x.shape
    C_out, C_in_w, K, K2 = weight.shape
    assert C_in_w == C_in and K == K2
    gsize = alpha_logits.shape[0]

    H_p, W_p = H + 2 * padding, W + 2 * padding
    H_out = (H_p - K) // stride + 1
    W_out = (W_p - K) // stride + 1
    M_img = H_out * W_out
    Kc = C_in * K * K

    # NHWC + spatial zero pad (single cheap layout pass; no K*K patch expansion).
    x_nhwc = jnp.transpose(x, (0, 2, 3, 1))
    if padding:
        x_nhwc = jnp.pad(
            x_nhwc, ((0, 0), (padding, padding), (padding, padding), (0, 0)))

    # Weight (O, I, kh, kw) -> (kh, kw, I, O) -> (Kc, C_out); fold the gate in.
    w_mat = jnp.transpose(weight, (2, 3, 1, 0)).reshape(Kc, C_out).astype(jnp.float32)
    if C_out % gsize == 0:
        gate = jnp.tile(jax.nn.sigmoid(alpha_logits.astype(jnp.float32)),
                        C_out // gsize)            # gate[c] = sigmoid(alpha)[c % gsize]
        w_mat = w_mat * gate[None, :]
    # else: OrientationGate is the identity (matches the PyTorch module).

    # Lane-dense output channels: pad C_out up to a multiple of 128.
    C_out_pad = pl.cdiv(C_out, 128) * 128
    if C_out_pad != C_out:
        w_mat = jnp.pad(w_mat, ((0, 0), (0, C_out_pad - C_out)))
    w_mat = w_mat.astype(x.dtype)

    kernel = functools.partial(_conv_gate_kernel, K=K, stride=stride,
                               H_out=H_out, W_out=W_out)

    out_flat = pl.pallas_call(
        kernel,
        out_shape=jax.ShapeDtypeStruct((N, M_img, C_out_pad), x.dtype),
        grid_spec=pltpu.PrefetchScalarGridSpec(
            num_scalar_prefetch=0,
            grid=(N,),
            in_specs=[
                pl.BlockSpec((1, H_p, W_p, C_in), lambda n: (n, 0, 0, 0)),
                pl.BlockSpec((Kc, C_out_pad), lambda n: (0, 0)),
            ],
            out_specs=pl.BlockSpec((1, M_img, C_out_pad), lambda n: (n, 0, 0)),
        ),
        compiler_params=pltpu.CompilerParams(
            dimension_semantics=("parallel",),
            vmem_limit_bytes=32 * 1024 * 1024),
    )(x_nhwc, w_mat)

    # Drop lane padding, restore NCHW (tiny output; single XLA layout pass).
    out = out_flat[:, :, :C_out].reshape(N, H_out, W_out, C_out)
    return jnp.transpose(out, (0, 3, 1, 2))


def _reference(x, weight, alpha_logits, *, stride=1, padding=0):
    """Pure-JAX reference (conv + orientation gate) for correctness checking."""
    y = jax.lax.conv_general_dilated(
        x, weight, window_strides=(stride, stride),
        padding=[(padding, padding), (padding, padding)],
        dimension_numbers=("NCHW", "OIHW", "NCHW"))
    C_out = weight.shape[0]
    gsize = alpha_logits.shape[0]
    if C_out % gsize == 0:
        g = jnp.tile(jax.nn.sigmoid(alpha_logits), C_out // gsize)
        y = y * g.reshape(1, C_out, 1, 1)
    return y


if __name__ == "__main__":
    # Shapes consistent with the module: gspace with 4 rotations -> gsize=4;
    # in_type 4 channels, out_type 8 channels (n_rep=2), 3x3 kernel.
    N, C_in, H, W = 2, 4, 16, 16
    C_out, K, gsize = 8, 3, 4

    key = jax.random.PRNGKey(0)
    kx, kw, ka = jax.random.split(key, 3)
    x = jax.random.normal(kx, (N, C_in, H, W), dtype=jnp.float32)
    # Synthetic "expanded" R2Conv filter (no e2cnn basis expansion / checkpoint).
    weight = jax.random.normal(kw, (C_out, C_in, K, K), dtype=jnp.float32) * 0.1
    # OrientationGate.__init__ uses zeros; use non-zero logits here to actually
    # exercise the per-orientation gating in the test.
    alpha_logits = jax.random.normal(ka, (gsize,), dtype=jnp.float32)
    # Logits length that does NOT divide C_out -> gate must act as identity.
    alpha_logits_id = jax.random.normal(ka, (3,), dtype=jnp.float32)

    cases = (
        (alpha_logits, 1, 1),      # gated, "same" padding
        (alpha_logits, 1, 0),      # gated, "valid" padding
        (alpha_logits_id, 1, 1),   # identity-gate branch (C_out % gsize != 0)
    )
    for logits, stride, padding in cases:
        out = partial_r2_conv(x, weight, logits, stride=stride, padding=padding)
        out = jax.block_until_ready(out)
        ref = _reference(x, weight, logits, stride=stride, padding=padding)
        assert out.shape == ref.shape, (out.shape, ref.shape)
        assert jnp.allclose(out, ref, atol=2e-4, rtol=2e-4), \
            f"mismatch vs reference (gsize={logits.shape[0]}, stride={stride}, padding={padding})"

    print("KERNEL_OK")
</pallas_src>

<mosaic_0001>
module attributes {stable_mosaic.version = 11 : i64} {
  func.func @_conv_gate_kernel(%arg0: i32, %arg1: memref<1x18x18x4xf32, #tpu.memory_space<vmem>>, %arg2: memref<36x128xf32, #tpu.memory_space<vmem>>, %arg3: memref<1x256x128xf32, #tpu.memory_space<vmem>>) attributes {dimension_semantics = [#tpu.dimension_semantics<parallel>], iteration_bounds = array<i64: 2>, scalar_prefetch = 0 : i64, scratch_operands = 0 : i64, tpu.core_type = #tpu.core_type<tc>, window_params = [{transform_indices = @transform_0, window_bounds = array<i64: 1, 18, 18, 4>}, {pipeline_mode = #tpu.pipeline_mode<synchronous>, transform_indices = @transform_1, window_bounds = array<i64: 36, 128>}, {transform_indices = @transform_2, window_bounds = array<i64: 1, 256, 128>}]} {
    %c0 = arith.constant 0 : index
    %c0_0 = arith.constant 0 : index
    %c0_1 = arith.constant 0 : index
    %c0_2 = arith.constant 0 : index
    %0 = vector.load %arg1[%c0, %c0_0, %c0_1, %c0_2] : memref<1x18x18x4xf32, #tpu.memory_space<vmem>>, vector<1x16x16x4xf32>
    %1 = vector.shape_cast %0 : vector<1x16x16x4xf32> to vector<16x16x4xf32>
    %c0_3 = arith.constant 0 : index
    %c0_4 = arith.constant 0 : index
    %c1 = arith.constant 1 : index
    %c0_5 = arith.constant 0 : index
    %2 = vector.load %arg1[%c0_3, %c0_4, %c1, %c0_5] : memref<1x18x18x4xf32, #tpu.memory_space<vmem>>, vector<1x16x16x4xf32>
    %3 = vector.shape_cast %2 : vector<1x16x16x4xf32> to vector<16x16x4xf32>
    %c0_6 = arith.constant 0 : index
    %c0_7 = arith.constant 0 : index
    %c2 = arith.constant 2 : index
    %c0_8 = arith.constant 0 : index
    %4 = vector.load %arg1[%c0_6, %c0_7, %c2, %c0_8] : memref<1x18x18x4xf32, #tpu.memory_space<vmem>>, vector<1x16x16x4xf32>
    %5 = vector.shape_cast %4 : vector<1x16x16x4xf32> to vector<16x16x4xf32>
    %c0_9 = arith.constant 0 : index
    %c1_10 = arith.constant 1 : index
    %c0_11 = arith.constant 0 : index
    %c0_12 = arith.constant 0 : index
    %6 = vector.load %arg1[%c0_9, %c1_10, %c0_11, %c0_12] : memref<1x18x18x4xf32, #tpu.memory_space<vmem>>, vector<1x16x16x4xf32>
    %7 = vector.shape_cast %6 : vector<1x16x16x4xf32> to vector<16x16x4xf32>
    %c0_13 = arith.constant 0 : index
    %c1_14 = arith.constant 1 : index
    %c1_15 = arith.constant 1 : index
    %c0_16 = arith.constant 0 : index
    %8 = vector.load %arg1[%c0_13, %c1_14, %c1_15, %c0_16] : memref<1x18x18x4xf32, #tpu.memory_space<vmem>>, vector<1x16x16x4xf32>
    %9 = vector.shape_cast %8 : vector<1x16x16x4xf32> to vector<16x16x4xf32>
    %c0_17 = arith.constant 0 : index
    %c1_18 = arith.constant 1 : index
    %c2_19 = arith.constant 2 : index
    %c0_20 = arith.constant 0 : index
    %10 = vector.load %arg1[%c0_17, %c1_18, %c2_19, %c0_20] : memref<1x18x18x4xf32, #tpu.memory_space<vmem>>, vector<1x16x16x4xf32>
    %11 = vector.shape_cast %10 : vector<1x16x16x4xf32> to vector<16x16x4xf32>
    %c0_21 = arith.constant 0 : index
    %c2_22 = arith.constant 2 : index
    %c0_23 = arith.constant 0 : index
    %c0_24 = arith.constant 0 : index
    %12 = vector.load %arg1[%c0_21, %c2_22, %c0_23, %c0_24] : memref<1x18x18x4xf32, #tpu.memory_space<vmem>>, vector<1x16x16x4xf32>
    %13 = vector.shape_cast %12 : vector<1x16x16x4xf32> to vector<16x16x4xf32>
    %c0_25 = arith.constant 0 : index
    %c2_26 = arith.constant 2 : index
    %c1_27 = arith.constant 1 : index
    %c0_28 = arith.constant 0 : index
    %14 = vector.load %arg1[%c0_25, %c2_26, %c1_27, %c0_28] : memref<1x18x18x4xf32, #tpu.memory_space<vmem>>, vector<1x16x16x4xf32>
    %15 = vector.shape_cast %14 : vector<1x16x16x4xf32> to vector<16x16x4xf32>
    %c0_29 = arith.constant 0 : index
    %c2_30 = arith.constant 2 : index
    %c2_31 = arith.constant 2 : index
    %c0_32 = arith.constant 0 : index
    %16 = vector.load %arg1[%c0_29, %c2_30, %c2_31, %c0_32] : memref<1x18x18x4xf32, #tpu.memory_space<vmem>>, vector<1x16x16x4xf32>
    %17 = vector.shape_cast %16 : vector<1x16x16x4xf32> to vector<16x16x4xf32>
    %18 = tpu.concatenate %1, %3, %5, %7, %9, %11, %13, %15, %17 in 2 : vector<16x16x4xf32>, vector<16x16x4xf32>, vector<16x16x4xf32>, vector<16x16x4xf32>, vector<16x16x4xf32>, vector<16x16x4xf32>, vector<16x16x4xf32>, vector<16x16x4xf32>, vector<16x16x4xf32> -> vector<16x16x36xf32>
    %19 = vector.shape_cast %18 : vector<16x16x36xf32> to vector<256x36xf32>
    %c0_33 = arith.constant 0 : index
    %c0_34 = arith.constant 0 : index
    %20 = vector.load %arg2[%c0_33, %c0_34] : memref<36x128xf32, #tpu.memory_space<vmem>>, vector<36x128xf32>
    %cst = arith.constant dense<0.000000e+00> : vector<256x128xf32>
    %21 = tpu.matmul %19, %20, %cst {dimension_numbers = #tpu.dot_dimension_numbers<[1], [0], [0], [1], [0, 0, 1, 1], [], []>} : vector<256x36xf32>, vector<36x128xf32>, vector<256x128xf32> -> vector<256x128xf32>
    %c0_35 = arith.constant 0 : index
    %c0_36 = arith.constant 0 : index
    %c0_37 = arith.constant 0 : index
    %22 = vector.load %arg3[%c0_35, %c0_36, %c0_37] : memref<1x256x128xf32, #tpu.memory_space<vmem>>, vector<1x256x128xf32>
    %23 = vector.shape_cast %22 : vector<1x256x128xf32> to vector<256x128xf32>
    %24 = vector.shape_cast %21 : vector<256x128xf32> to vector<1x256x128xf32>
    tpu.vector_store %arg3[%c0_35, %c0_36, %c0_37], %24 {strides = array<i32>} : memref<1x256x128xf32, #tpu.memory_space<vmem>>, vector<1x256x128xf32>,
    return
  }
  func.func @transform_0(%arg0: i32) -> (i32, i32, i32, i32) {
    %c0_i32 = arith.constant 0 : i32
    %c0_i32_0 = arith.constant 0 : i32
    %c0_i32_1 = arith.constant 0 : i32
    %c0_i32_2 = arith.constant 0 : i32
    return %arg0, %c0_i32, %c0_i32_0, %c0_i32_1 : i32, i32, i32, i32
  }
  func.func @transform_1(%arg0: i32) -> (i32, i32) {
    %c0_i32 = arith.constant 0 : i32
    %c0_i32_0 = arith.constant 0 : i32
    %c0_i32_1 = arith.constant 0 : i32
    return %c0_i32, %c0_i32_0 : i32, i32
  }
  func.func @transform_2(%arg0: i32) -> (i32, i32, i32) {
    %c0_i32 = arith.constant 0 : i32
    %c0_i32_0 = arith.constant 0 : i32
    %c0_i32_1 = arith.constant 0 : i32
    return %arg0, %c0_i32, %c0_i32_0 : i32, i32, i32
  }
}

</mosaic_0001>

<bundles_post_ra>
// kernel: tile.8
= control target key start
LH: loop header
LB: loop body
LE: loop exit
PB: predicated region body
PF: predicated region fallthrough
CT: control target
= control target key end

     0   :  { %s22_s0 = inlined_call_operand.vmem [shape: f32[4], index: 0, kind: input, shape index: {}]   ;;  %s23_s1 = inlined_call_operand.vmem [shape: f32[2,4], index: 1, kind: output, shape index: {}]  }
   0x1   :  { %v4_v0 = vld [vmem:[%s22_s0] ss:$0 sm:$0xff] }
   0x2   :  { %5 = vst [vmem:[%s23_s1] sm:$0x3] %v4_v0 }

// kernel: mul.5
= control target key start
LH: loop header
LB: loop body
LE: loop exit
PB: predicated region body
PF: predicated region fallthrough
CT: control target
= control target key end

     0   :  { %vm7_vm0 = vcmask 31744   ;;  %vm13_vm1 = vcmask 64544   ;;  %s39_s0 = inlined_call_operand.vmem [shape: f32[2,4], index: 0, kind: input, shape index: {}]   ;;  %s40_s1 = inlined_call_operand.vmem [shape: f32[8], index: 1, kind: output, shape index: {}]  }
   0x1   :  { %v4_v0 = vld [vmem:[%s39_s0] sm:$0x3]  ;;  %s22_s0 = smov 4  }
   0x2   :  { %5 = vst [vmem:[#allocation1] sm:$0x3] %v4_v0 }
   0x9   :  { %v10_v1 = vld [vmem:[#allocation1 + $0x1] sm:$0x1]   ;;  %v6_v2 = vld [vmem:[#allocation1] sm:$0x1]  }
   0xa   :  { %11 = vrot.lane.b32.xlu0 %v10_v1, %s22_s0  ;;  %8 = vst.msk [vmem:[#allocation0] sm:$0x1] %vm7_vm0, %v6_v2  }
  0x7c   :  { %v12_v3 = vpop.permute.xlu0 %11  }
  0x7d   :  { %14 = vst.msk [vmem:[#allocation0] sm:$0x1] %vm13_vm1, %v12_v3  }
  0x84   :  { %v17_v4 = vld [vmem:[#allocation0] sm:$0x1] }
  0x85   :  { %20 = vst [vmem:[%s40_s1] sm:$0x1] %v17_v4 }

// kernel: partial_r2_conv.1
= control target key start
LH: loop header
LB: loop body
LE: loop exit
PB: predicated region body
PF: predicated region fallthrough
CT: control target
= control target key end

     0   :  { %s2331_s9 = smov 0   ;;  %s4051_s0 = inlined_call_operand.vmem [shape: f32[2,18,18,4], index: 0, kind: input, shape index: {}]   ;;  %s4052_s1 = inlined_call_operand.vmem [shape: f32[36,128], index: 1, kind: input, shape index: {}]   ;;  %s4053_s2 = inlined_call_operand.vmem [shape: f32[2,256,128], index: 2, kind: output, shape index: {}]  }
   0x1 LB: > { %s2028_s10 = sadd.s32 4294967295, %s2306_s9   ;;  %p2032_p0 = scmp.ge.s32.totalorder %s2306_s9, 1  ;;  %s2306_s9 = sphi %s2331_s9, %s12_s9  }
   0x2   : > { %p112_p1 = scmp.lt.s32.totalorder %s2306_s9, 3 }
   0x4   : > { %p113_p2 = pnand %p2032_p0, %p112_p1 }
   0x6   : > { %116 = sbr.rel (%p113_p2) target bundleno = 942 (0x3ae), region = 28 }
   0xb   : > { %p134_p3 = scmp.lt.s32.totalorder %s2028_s10, 1  ;;  %s2308_s15 = smov 4   ;;  %vm1458_vm0 = vcmask 31744   ;;  %vm1491_vm1 = vcmask 64512   ;;  %vm1524_vm2 = vcmask 97280   ;;  %vm1557_vm3 = vcmask 130048  }
   0xc   : > { %s2309_s16 = smov 8   ;;  %s2310_s17 = smov 12   ;;  %vm1590_vm4 = vcmask 162816   ;;  %vm1623_vm5 = vcmask 195584   ;;  %vm1824_vm6 = vcmask 1043456   ;;  %vm1656_vm7 = vcmask 228352  }
   0xd   : > { %s4345_s10 = smov (!%p134_p3, %s2028_s10), 1  ;;  %s2311_s18 = smov 16   ;;  %vm1689_vm8 = vcmask 261120   ;;  %vm1727_vm9 = vcmask 293888  }
   0xe   : > { %s2279_s11 = smul.u32 432, %s4345_s10  ;;  %s2312_s19 = smov 20  }
   0xf   : > { %s2313_s20 = smov 24   ;;  %s2314_s21 = smov 28  }
  0x10   : > { %s2345_s14 = scalar_lea.vmem %s4051_s0, %s2279_s11  ;;  %s2315_s22 = smov 32  }
  0x11   : > { %v2348_v0 = vld [vmem:[%s2345_s14 + $0x31] sm:$0xff]  ;;  %v2351_v1 = vld [vmem:[%s2345_s14 + $0x19] sm:$0xff]  ;;  %v176_v2 = vld [vmem:[%s2345_s14 + $0x1] sm:$0xff]  ;;  %s2263_s5 = sshll.u32 %s4345_s10, 8 }
  0x12   : > { %474 = vrot.lane.b32.xlu2 %v2348_v0, %s2308_s15  ;;  %470 = vrot.lane.b32.xlu1 %v2351_v1, %s2308_s15  ;;  %v2360_v3 = vld [vmem:[%s2345_s14 + $0x39] sm:$0xff]  ;;  %v2363_v4 = vld [vmem:[%s2345_s14 + $0x21] sm:$0xff]  ;;  %s3956_s8 = scalar_lea.vmem %s4053_s2, %s2263_s5 }
  0x13   : > { %466 = vrot.lane.b32.xlu0 %v176_v2, %s2308_s15  ;;  %v177_v5 = vld [vmem:[%s2345_s14 + $0x9] sm:$0xff]  ;;  %v2372_v6 = vld [vmem:[%s2345_s14 + $0x61] sm:$0xff]  ;;  %v2375_v7 = vld [vmem:[%s2345_s14 + $0x51] sm:$0xff] }
  0x14   : > { %v2378_v8 = vld [vmem:[%s2345_s14 + $0x49] sm:$0xff]  ;;  %v2387_v9 = vld [vmem:[%s2345_s14 + $0x81] sm:$0xff]  ;;  %v2390_v10 = vld [vmem:[%s2345_s14 + $0x79] sm:$0xff] }
  0x15   : > { %v2393_v11 = vld [vmem:[%s2345_s14 + $0x69] sm:$0xff]  ;;  %v2405_v13 = vld [vmem:[%s2345_s14 + $0x99] sm:$0xff]  ;;  %v2408_v14 = vld [vmem:[%s2345_s14 + $0x91] sm:$0xff] }
  0x16   : > { %v2402_v12 = vld [vmem:[%s2345_s14 + $0xa9] sm:$0xff]  ;;  %v2420_v16 = vld [vmem:[%s2345_s14 + $0xc1] sm:$0xff]  ;;  %v2423_v17 = vld [vmem:[%s2345_s14 + $0xb1] sm:$0xff] }
  0x17   : > { %v2417_v15 = vld [vmem:[%s2345_s14 + $0xc9] sm:$0xff]  ;;  %v2432_v18 = vld [vmem:[%s2345_s14 + $0xf1] sm:$0xff]  ;;  %v2435_v19 = vld [vmem:[%s2345_s14 + $0xe1] sm:$0xff] }
  0x18   : > { %v2438_v20 = vld [vmem:[%s2345_s14 + $0xd9] sm:$0xff]  ;;  %v2447_v21 = vld [vmem:[%s2345_s14 + $0x111] sm:$0xff]  ;;  %v2450_v22 = vld [vmem:[%s2345_s14 + $0x109] sm:$0xff] }
  0x19   : > { %v2453_v23 = vld [vmem:[%s2345_s14 + $0xf9] sm:$0xff]  ;;  %v2465_v25 = vld [vmem:[%s2345_s14 + $0x129] sm:$0xff]  ;;  %v2468_v26 = vld [vmem:[%s2345_s14 + $0x121] sm:$0xff] }
  0x1a   : > { %476 = vrot.lane.b32.xlu2 %v2360_v3, %s2308_s15  ;;  %472 = vrot.lane.b32.xlu1 %v2363_v4, %s2308_s15  ;;  %v2462_v24 = vld [vmem:[%s2345_s14 + $0x139] sm:$0xff]  ;;  %v2480_v28 = vld [vmem:[%s2345_s14 + $0x151] sm:$0xff] }
  0x1b   : > { %468 = vrot.lane.b32.xlu0 %v177_v5, %s2308_s15  ;;  %v2477_v27 = vld [vmem:[%s2345_s14 + $0x159] sm:$0xff]  ;;  %v2483_v29 = vld [vmem:[%s2345_s14 + $0x141] sm:$0xff]  ;;  %v2493_v31 = vld [vmem:[%s2345_s14 + $0x171] sm:$0xff] }
  0x1c   : > { %v208_v30 = vld [vmem:[%s2345_s14 + $0x2] sm:$0xff]  ;;  %v2507_v34 = vld [vmem:[%s2345_s14 + $0x1a] sm:$0xff]  ;;  %v209_v35 = vld [vmem:[%s2345_s14 + $0xa] sm:$0xff] }
  0x1d   : > { %v2496_v32 = vld [vmem:[%s2345_s14 + $0x169] sm:$0xff]  ;;  %v2521_v38 = vld [vmem:[%s2345_s14 + $0x3a] sm:$0xff]  ;;  %v2524_v39 = vld [vmem:[%s2345_s14 + $0x32] sm:$0xff] }
  0x1e   : > { %v2504_v33 = vld [vmem:[%s2345_s14 + $0x22] sm:$0xff]  ;;  %v2518_v37 = vld [vmem:[%s2345_s14 + $0x4a] sm:$0xff]  ;;  %v2541_v43 = vld [vmem:[%s2345_s14 + $0x52] sm:$0xff] }
  0x1f   : > { %v2535_v41 = vld [vmem:[%s2345_s14 + $0x6a] sm:$0xff]  ;;  %v2538_v42 = vld [vmem:[%s2345_s14 + $0x62] sm:$0xff]  ;;  %v2552_v45 = vld [vmem:[%s2345_s14 + $0x92] sm:$0xff] }
  0x20   : > { %v2555_v46 = vld [vmem:[%s2345_s14 + $0x82] sm:$0xff]  ;;  %v2558_v47 = vld [vmem:[%s2345_s14 + $0x7a] sm:$0xff]  ;;  %v2573_v51 = vld [vmem:[%s2345_s14 + $0xb2] sm:$0xff] }
  0x21   : > { %v2576_v52 = vld [vmem:[%s2345_s14 + $0xaa] sm:$0xff]  ;;  %v2579_v53 = vld [vmem:[%s2345_s14 + $0x9a] sm:$0xff]  ;;  %v2600_v59 = vld [vmem:[%s2345_s14 + $0xc2] sm:$0xff] }
  0x22   : > { %482 = vrot.lane.b32.xlu2 %v2372_v6, %s2308_s15  ;;  %480 = vrot.lane.b32.xlu1 %v2375_v7, %s2308_s15  ;;  %v2594_v57 = vld [vmem:[%s2345_s14 + $0xda] sm:$0xff]  ;;  %v2597_v58 = vld [vmem:[%s2345_s14 + $0xca] sm:$0xff] }
  0x23   : > { %478 = vrot.lane.b32.xlu0 %v2378_v8, %s2308_s15  ;;  %v2615_v63 = vld [vmem:[%s2345_s14 + $0xfa] sm:$0xff]  ;;  %v2618_v2 = vld [vmem:[%s2345_s14 + $0xf2] sm:$0xff]  ;;  %v2621_v5 = vld [vmem:[%s2345_s14 + $0xe2] sm:$0xff] }
  0x2a   : > { %488 = vrot.lane.b32.xlu2 %v2387_v9, %s2308_s15  ;;  %486 = vrot.lane.b32.xlu1 %v2390_v10, %s2308_s15 }
  0x2b   : > { %484 = vrot.lane.b32.xlu0 %v2393_v11, %s2308_s15 }
  0x32   : > { %494 = vrot.lane.b32.xlu2 %v2402_v12, %s2308_s15  ;;  %492 = vrot.lane.b32.xlu1 %v2405_v13, %s2308_s15 }
  0x33   : > { %490 = vrot.lane.b32.xlu0 %v2408_v14, %s2308_s15 }
  0x3a   : > { %500 = vrot.lane.b32.xlu2 %v2417_v15, %s2308_s15  ;;  %498 = vrot.lane.b32.xlu1 %v2420_v16, %s2308_s15 }
  0x3b   : > { %496 = vrot.lane.b32.xlu0 %v2423_v17, %s2308_s15 }
  0x42   : > { %506 = vrot.lane.b32.xlu2 %v2432_v18, %s2308_s15  ;;  %504 = vrot.lane.b32.xlu1 %v2435_v19, %s2308_s15 }
  0x43   : > { %502 = vrot.lane.b32.xlu0 %v2438_v20, %s2308_s15 }
  0x4a   : > { %512 = vrot.lane.b32.xlu2 %v2447_v21, %s2308_s15  ;;  %510 = vrot.lane.b32.xlu1 %v2450_v22, %s2308_s15 }
  0x4b   : > { %508 = vrot.lane.b32.xlu0 %v2453_v23, %s2308_s15 }
  0x52   : > { %518 = vrot.lane.b32.xlu2 %v2462_v24, %s2308_s15  ;;  %516 = vrot.lane.b32.xlu1 %v2465_v25, %s2308_s15 }
  0x53   : > { %514 = vrot.lane.b32.xlu0 %v2468_v26, %s2308_s15 }
  0x5a   : > { %524 = vrot.lane.b32.xlu2 %v2477_v27, %s2308_s15  ;;  %522 = vrot.lane.b32.xlu1 %v2480_v28, %s2308_s15 }
  0x5b   : > { %520 = vrot.lane.b32.xlu0 %v2483_v29, %s2308_s15 }
  0x62   : > { %594 = vrot.lane.b32.xlu2 %v208_v30, %s2309_s16  ;;  %528 = vrot.lane.b32.xlu1 %v2493_v31, %s2308_s15 }
  0x63   : > { %526 = vrot.lane.b32.xlu0 %v2496_v32, %s2308_s15 }
  0x6a   : > { %600 = vrot.lane.b32.xlu2 %v2504_v33, %s2309_s16  ;;  %598 = vrot.lane.b32.xlu1 %v2507_v34, %s2309_s16 }
  0x6b   : > { %596 = vrot.lane.b32.xlu0 %v209_v35, %s2309_s16 }
  0x6c   : > { %v2515_v36 = vpop.permute.xlu2 %474 }
  0x6d   : > { %4103 = vst [vmem:[#allocation2_spill] sm:$0xff] %v2515_v36  ;;  %v2660_v36 = vld [vmem:[%s2345_s14 + $0x13a] sm:$0xff] }
  0x72   : > { %606 = vrot.lane.b32.xlu2 %v2518_v37, %s2309_s16  ;;  %604 = vrot.lane.b32.xlu1 %v2521_v38, %s2309_s16 }
  0x73   : > { %602 = vrot.lane.b32.xlu0 %v2524_v39, %s2309_s16 }
  0x74   : > { %v2532_v40 = vpop.permute.xlu2 %476 }
  0x75   : > { %4104 = vst [vmem:[#allocation3_spill] sm:$0xff] %v2532_v40  ;;  %v2642_v40 = vld [vmem:[%s2345_s14 + $0x10a] sm:$0xff] }
  0x7a   : > { %612 = vrot.lane.b32.xlu2 %v2535_v41, %s2309_s16  ;;  %610 = vrot.lane.b32.xlu1 %v2538_v42, %s2309_s16 }
  0x7b   : > { %608 = vrot.lane.b32.xlu0 %v2541_v43, %s2309_s16 }
  0x7c   : > { %v2549_v44 = vpop.permute.xlu2 %482 }
  0x7d   : > { %4105 = vst [vmem:[#allocation4_spill] sm:$0xff] %v2549_v44 }
  0x82   : > { %618 = vrot.lane.b32.xlu2 %v2552_v45, %s2309_s16  ;;  %616 = vrot.lane.b32.xlu1 %v2555_v46, %s2309_s16 }
  0x83   : > { %614 = vrot.lane.b32.xlu0 %v2558_v47, %s2309_s16 }
  0x84   : > { %v2566_v48 = vpop.permute.xlu2 %488  ;;  %v2568_v49 = vpop.permute.xlu1 %470 }
  0x85   : > { %4106 = vst [vmem:[#allocation5_spill] sm:$0xff] %v2566_v48  ;;  %v2570_v50 = vpop.permute.xlu0 %466  ;;  %v2639_v48 = vld [vmem:[%s2345_s14 + $0x112] sm:$0xff] }
  0x86   : > { %4107 = vst [vmem:[#allocation6_spill] sm:$0xff] %v2568_v49  ;;  %v2699_v49 = vld [vmem:[%s2345_s14 + $0x172] sm:$0xff] }
  0x87   : > { %4108 = vst [vmem:[#allocation7_spill] sm:$0xff] %v2570_v50  ;;  %v2636_v50 = vld [vmem:[%s2345_s14 + $0x122] sm:$0xff] }
  0x88   : > { %4131 = vst [vmem:[#allocation30_spill] sm:$0xff] %v2699_v49 }
  0x8a   : > { %624 = vrot.lane.b32.xlu2 %v2573_v51, %s2309_s16  ;;  %622 = vrot.lane.b32.xlu1 %v2576_v52, %s2309_s16 }
  0x8b   : > { %620 = vrot.lane.b32.xlu0 %v2579_v53, %s2309_s16 }
  0x8c   : > { %v2587_v54 = vpop.permute.xlu2 %494  ;;  %v2589_v55 = vpop.permute.xlu1 %472 }
  0x8d   : > { %4109 = vst [vmem:[#allocation8_spill] sm:$0xff] %v2587_v54  ;;  %v2591_v56 = vpop.permute.xlu0 %468  ;;  %v2684_v54 = vld [vmem:[%s2345_s14 + $0x152] sm:$0xff] }
  0x8e   : > { %4110 = vst [vmem:[#allocation9_spill] sm:$0xff] %v2589_v55  ;;  %v2702_v55 = vld [vmem:[%s2345_s14 + $0x18] sm:$0xff] }
  0x8f   : > { %4111 = vst [vmem:[#allocation10_spill] sm:$0xff] %v2591_v56  ;;  %v2663_v56 = vld [vmem:[%s2345_s14 + $0x12a] sm:$0xff] }
  0x90   : > { %4127 = vst [vmem:[#allocation26_spill] sm:$0xff] %v2684_v54 }
  0x91   : > { %4132 = vst [vmem:[#allocation31_spill] sm:$0xff] %v2702_v55 }
  0x92   : > { %630 = vrot.lane.b32.xlu2 %v2594_v57, %s2309_s16  ;;  %628 = vrot.lane.b32.xlu1 %v2597_v58, %s2309_s16 }
  0x93   : > { %626 = vrot.lane.b32.xlu0 %v2600_v59, %s2309_s16 }
  0x94   : > { %v2608_v60 = vpop.permute.xlu2 %500  ;;  %v2610_v61 = vpop.permute.xlu1 %480 }
  0x95   : > { %4112 = vst [vmem:[#allocation11_spill] sm:$0xff] %v2608_v60  ;;  %v2612_v62 = vpop.permute.xlu0 %478  ;;  %v2678_v60 = vld [vmem:[%s2345_s14 + $0x16a] sm:$0xff] }
  0x96   : > { %4113 = vst [vmem:[#allocation12_spill] sm:$0xff] %v2610_v61  ;;  %v2657_v61 = vld [vmem:[%s2345_s14 + $0x142] sm:$0xff] }
  0x97   : > { %4114 = vst [vmem:[#allocation13_spill] sm:$0xff] %v2612_v62 }
  0x98   : > { %4121 = vst [vmem:[#allocation20_spill] sm:$0xff] %v2657_v61 }
  0x99   : > { %4125 = vst [vmem:[#allocation24_spill] sm:$0xff] %v2678_v60 }
  0x9a   : > { %636 = vrot.lane.b32.xlu2 %v2615_v63, %s2309_s16  ;;  %634 = vrot.lane.b32.xlu1 %v2618_v2, %s2309_s16 }
  0x9b   : > { %632 = vrot.lane.b32.xlu0 %v2621_v5, %s2309_s16 }
  0x9c   : > { %v2629_v30 = vpop.permute.xlu2 %506  ;;  %v2631_v35 = vpop.permute.xlu1 %486 }
  0x9d   : > { %4115 = vst [vmem:[#allocation14_spill] sm:$0xff] %v2629_v30  ;;  %v2633_v44 = vpop.permute.xlu0 %484 }
  0x9e   : > { %4116 = vst [vmem:[#allocation15_spill] sm:$0xff] %v2631_v35 }
  0x9f   : > { %4117 = vst [vmem:[#allocation16_spill] sm:$0xff] %v2633_v44 }
  0xa2   : > { %642 = vrot.lane.b32.xlu2 %v2636_v50, %s2309_s16  ;;  %640 = vrot.lane.b32.xlu1 %v2639_v48, %s2309_s16 }
  0xa3   : > { %638 = vrot.lane.b32.xlu0 %v2642_v40, %s2309_s16 }
  0xa4   : > { %v2650_v62 = vpop.permute.xlu2 %512  ;;  %v2652_v44 = vpop.permute.xlu1 %492 }
  0xa5   : > { %4118 = vst [vmem:[#allocation17_spill] sm:$0xff] %v2650_v62  ;;  %v2654_v35 = vpop.permute.xlu0 %490 }
  0xa6   : > { %4119 = vst [vmem:[#allocation18_spill] sm:$0xff] %v2652_v44  ;;  %v2681_v44 = vld [vmem:[%s2345_s14 + $0x15a] sm:$0xff] }
  0xa7   : > { %4120 = vst [vmem:[#allocation19_spill] sm:$0xff] %v2654_v35 }
  0xa8   : > { %4126 = vst [vmem:[#allocation25_spill] sm:$0xff] %v2681_v44 }
  0xaa   : > { %648 = vrot.lane.b32.xlu2 %v2657_v61, %s2309_s16  ;;  %646 = vrot.lane.b32.xlu1 %v2660_v36, %s2309_s16  ;;  %v2720_v61 = vld [vmem:[%s2345_s14 + $0x38] sm:$0xff] }
  0xab   : > { %644 = vrot.lane.b32.xlu0 %v2663_v56, %s2309_s16  ;;  %4137 = vst [vmem:[#allocation36_spill] sm:$0xff] %v2720_v61 }
  0xac   : > { %v2671_v62 = vpop.permute.xlu2 %518  ;;  %v2673_v35 = vpop.permute.xlu1 %498 }
  0xad   : > { %4122 = vst [vmem:[#allocation21_spill] sm:$0xff] %v2671_v62  ;;  %v2675_v30 = vpop.permute.xlu0 %496 }
  0xae   : > { %4123 = vst [vmem:[#allocation22_spill] sm:$0xff] %v2673_v35 }
  0xaf   : > { %4124 = vst [vmem:[#allocation23_spill] sm:$0xff] %v2675_v30 }
  0xb2   : > { %654 = vrot.lane.b32.xlu2 %v2678_v60, %s2309_s16  ;;  %652 = vrot.lane.b32.xlu1 %v2681_v44, %s2309_s16  ;;  %v2705_v60 = vld [vmem:[%s2345_s14 + $0x20] sm:$0xff]  ;;  %v2726_v44 = vld [vmem:[%s2345_s14 + $0x30] sm:$0xff] }
  0xb3   : > { %650 = vrot.lane.b32.xlu0 %v2684_v54, %s2309_s16  ;;  %4133 = vst [vmem:[#allocation32_spill] sm:$0xff] %v2705_v60  ;;  %v2723_v54 = vld [vmem:[%s2345_s14 + $0x48] sm:$0xff] }
  0xb4   : > { %v2692_v62 = vpop.permute.xlu2 %524  ;;  %v2694_v35 = vpop.permute.xlu1 %504  ;;  %4138 = vst [vmem:[#allocation37_spill] sm:$0xff] %v2723_v54 }
  0xb5   : > { %4128 = vst [vmem:[#allocation27_spill] sm:$0xff] %v2692_v62  ;;  %v2696_v30 = vpop.permute.xlu0 %502 }
  0xb6   : > { %4129 = vst [vmem:[#allocation28_spill] sm:$0xff] %v2694_v35 }
  0xb7   : > { %4130 = vst [vmem:[#allocation29_spill] sm:$0xff] %v2696_v30 }
  0xb8   : > { %4139 = vst [vmem:[#allocation38_spill] sm:$0xff] %v2726_v44 }
  0xba   : > { %724 = vrot.lane.b32.xlu2 %v2705_v60, %s2310_s17  ;;  %722 = vrot.lane.b32.xlu1 %v2702_v55, %s2310_s17  ;;  %v152_v55 = vld [vmem:[%s2345_s14 + $0x60] sm:$0xff]  ;;  %v2742_v60 = vld [vmem:[%s2345_s14 + $0x68] sm:$0xff] }
  0xbb   : > { %656 = vrot.lane.b32.xlu0 %v2699_v49, %s2309_s16  ;;  %4143 = vst [vmem:[#allocation42_spill] sm:$0xff] %v2742_v60  ;;  %v2745_v49 = vld [vmem:[%s2345_s14 + $0x50] sm:$0xff] }
  0xbc   : > { %v2713_v62 = vpop.permute.xlu2 %594  ;;  %v2715_v35 = vpop.permute.xlu1 %510  ;;  %4144 = vst [vmem:[#allocation43_spill] sm:$0xff] %v2745_v49 }
  0xbd   : > { %4134 = vst [vmem:[#allocation33_spill] sm:$0xff] %v2713_v62  ;;  %v2717_v30 = vpop.permute.xlu0 %508 }
  0xbe   : > { %4135 = vst [vmem:[#allocation34_spill] sm:$0xff] %v2715_v35 }
  0xbf   : > { %4136 = vst [vmem:[#allocation35_spill] sm:$0xff] %v2717_v30 }
  0xc2   : > { %730 = vrot.lane.b32.xlu2 %v2723_v54, %s2310_s17  ;;  %728 = vrot.lane.b32.xlu1 %v2720_v61, %s2310_s17 }
  0xc3   : > { %726 = vrot.lane.b32.xlu0 %v2726_v44, %s2310_s17 }
  0xc4   : > { %v2734_v62 = vpop.permute.xlu2 %600  ;;  %v2736_v35 = vpop.permute.xlu1 %516 }
  0xc5   : > { %4140 = vst [vmem:[#allocation39_spill] sm:$0xff] %v2734_v62  ;;  %v2738_v30 = vpop.permute.xlu0 %514  ;;  %v2763_v62 = vld [vmem:[%s2345_s14 + $0x78] sm:$0xff] }
  0xc6   : > { %4141 = vst [vmem:[#allocation40_spill] sm:$0xff] %v2736_v35  ;;  %v2760_v35 = vld [vmem:[%s2345_s14 + $0x90] sm:$0xff] }
  0xc7   : > { %4142 = vst [vmem:[#allocation41_spill] sm:$0xff] %v2738_v30  ;;  %v155_v30 = vld [vmem:[%s2345_s14 + $0x80] sm:$0xff] }
  0xc8   : > { %4148 = vst [vmem:[#allocation47_spill] sm:$0xff] %v2760_v35 }
  0xc9   : > { %4149 = vst [vmem:[#allocation48_spill] sm:$0xff] %v2763_v62 }
  0xca   : > { %736 = vrot.lane.b32.xlu2 %v2742_v60, %s2310_s17  ;;  %734 = vrot.lane.b32.xlu1 %v152_v55, %s2310_s17  ;;  %v2777_v60 = vld [vmem:[%s2345_s14 + $0xa8] sm:$0xff] }
  0xcb   : > { %732 = vrot.lane.b32.xlu0 %v2745_v49, %s2310_s17  ;;  %4153 = vst [vmem:[#allocation52_spill] sm:$0xff] %v2777_v60  ;;  %v2783_v49 = vld [vmem:[%s2345_s14 + $0x98] sm:$0xff] }
  0xcc   : > { %v2752_v61 = vpop.permute.xlu2 %606  ;;  %v2754_v44 = vpop.permute.xlu1 %522  ;;  %4155 = vst [vmem:[#allocation54_spill] sm:$0xff] %v2783_v49 }
  0xcd   : > { %4145 = vst [vmem:[#allocation44_spill] sm:$0xff] %v2752_v61  ;;  %v2756_v54 = vpop.permute.xlu0 %520 }
  0xce   : > { %4146 = vst [vmem:[#allocation45_spill] sm:$0xff] %v2754_v44 }
  0xcf   : > { %4147 = vst [vmem:[#allocation46_spill] sm:$0xff] %v2756_v54  ;;  %v2780_v54 = vld [vmem:[%s2345_s14 + $0xb0] sm:$0xff] }
  0xd0   : > { %4154 = vst [vmem:[#allocation53_spill] sm:$0xff] %v2780_v54 }
  0xd2   : > { %742 = vrot.lane.b32.xlu2 %v2760_v35, %s2310_s17  ;;  %740 = vrot.lane.b32.xlu1 %v155_v30, %s2310_s17  ;;  %v2798_v35 = vld [vmem:[%s2345_s14 + $0xc8] sm:$0xff] }
  0xd3   : > { %738 = vrot.lane.b32.xlu0 %v2763_v62, %s2310_s17  ;;  %4159 = vst [vmem:[#allocation58_spill] sm:$0xff] %v2798_v35  ;;  %v2804_v62 = vld [vmem:[%s2345_s14 + $0xc0] sm:$0xff] }
  0xd4   : > { %v2770_v55 = vpop.permute.xlu2 %612  ;;  %v2772_v61 = vpop.permute.xlu1 %528  ;;  %4161 = vst [vmem:[#allocation60_spill] sm:$0xff] %v2804_v62 }
  0xd5   : > { %4150 = vst [vmem:[#allocation49_spill] sm:$0xff] %v2770_v55  ;;  %v2774_v44 = vpop.permute.xlu0 %526 }
  0xd6   : > { %4151 = vst [vmem:[#allocation50_spill] sm:$0xff] %v2772_v61  ;;  %v2801_v61 = vld [vmem:[%s2345_s14 + $0xd8] sm:$0xff] }
  0xd7   : > { %4152 = vst [vmem:[#allocation51_spill] sm:$0xff] %v2774_v44 }
  0xd8   : > { %4160 = vst [vmem:[#allocation59_spill] sm:$0xff] %v2801_v61 }
  0xda   : > { %748 = vrot.lane.b32.xlu2 %v2780_v54, %s2310_s17  ;;  %746 = vrot.lane.b32.xlu1 %v2777_v60, %s2310_s17  ;;  %v2819_v54 = vld [vmem:[%s2345_s14 + $0xf0] sm:$0xff] }
  0xdb   : > { %744 = vrot.lane.b32.xlu0 %v2783_v49, %s2310_s17  ;;  %4165 = vst [vmem:[#allocation64_spill] sm:$0xff] %v2819_v54  ;;  %v2825_v49 = vld [vmem:[%s2345_s14 + $0xe0] sm:$0xff] }
  0xdc   : > { %v2791_v30 = vpop.permute.xlu2 %618  ;;  %v2793_v55 = vpop.permute.xlu1 %598  ;;  %4167 = vst [vmem:[#allocation66_spill] sm:$0xff] %v2825_v49 }
  0xdd   : > { %4156 = vst [vmem:[#allocation55_spill] sm:$0xff] %v2791_v30  ;;  %v2795_v44 = vpop.permute.xlu0 %596 }
  0xde   : > { %4157 = vst [vmem:[#allocation56_spill] sm:$0xff] %v2793_v55  ;;  %v2822_v55 = vld [vmem:[%s2345_s14 + $0xf8] sm:$0xff] }
  0xdf   : > { %4158 = vst [vmem:[#allocation57_spill] sm:$0xff] %v2795_v44 }
  0xe0   : > { %4166 = vst [vmem:[#allocation65_spill] sm:$0xff] %v2822_v55 }
  0xe2   : > { %754 = vrot.lane.b32.xlu2 %v2801_v61, %s2310_s17  ;;  %752 = vrot.lane.b32.xlu1 %v2798_v35, %s2310_s17  ;;  %v2840_v61 = vld [vmem:[%s2345_s14 + $0x110] sm:$0xff] }
  0xe3   : > { %750 = vrot.lane.b32.xlu0 %v2804_v62, %s2310_s17  ;;  %4171 = vst [vmem:[#allocation70_spill] sm:$0xff] %v2840_v61  ;;  %v2846_v62 = vld [vmem:[%s2345_s14 + $0x108] sm:$0xff] }
  0xe4   : > { %v2812_v30 = vpop.permute.xlu2 %624  ;;  %v2814_v44 = vpop.permute.xlu1 %604  ;;  %4173 = vst [vmem:[#allocation72_spill] sm:$0xff] %v2846_v62 }
  0xe5   : > { %4162 = vst [vmem:[#allocation61_spill] sm:$0xff] %v2812_v30  ;;  %v2816_v60 = vpop.permute.xlu0 %602  ;;  %v2843_v30 = vld [vmem:[%s2345_s14 + $0x120] sm:$0xff] }
  0xe6   : > { %4163 = vst [vmem:[#allocation62_spill] sm:$0xff] %v2814_v44 }
  0xe7   : > { %4164 = vst [vmem:[#allocation63_spill] sm:$0xff] %v2816_v60 }
  0xe8   : > { %4172 = vst [vmem:[#allocation71_spill] sm:$0xff] %v2843_v30 }
  0xea   : > { %760 = vrot.lane.b32.xlu2 %v2822_v55, %s2310_s17  ;;  %758 = vrot.lane.b32.xlu1 %v2819_v54, %s2310_s17  ;;  %v2861_v55 = vld [vmem:[%s2345_s14 + $0x138] sm:$0xff] }
  0xeb   : > { %756 = vrot.lane.b32.xlu0 %v2825_v49, %s2310_s17  ;;  %4177 = vst [vmem:[#allocation76_spill] sm:$0xff] %v2861_v55  ;;  %v2867_v49 = vld [vmem:[%s2345_s14 + $0x128] sm:$0xff] }
  0xec   : > { %v2833_v44 = vpop.permute.xlu2 %630  ;;  %v2835_v60 = vpop.permute.xlu1 %610  ;;  %4179 = vst [vmem:[#allocation78_spill] sm:$0xff] %v2867_v49 }
  0xed   : > { %4168 = vst [vmem:[#allocation67_spill] sm:$0xff] %v2833_v44  ;;  %v2837_v35 = vpop.permute.xlu0 %608  ;;  %v2864_v44 = vld [vmem:[%s2345_s14 + $0x140] sm:$0xff] }
  0xee   : > { %4169 = vst [vmem:[#allocation68_spill] sm:$0xff] %v2835_v60 }
  0xef   : > { %4170 = vst [vmem:[#allocation69_spill] sm:$0xff] %v2837_v35 }
  0xf0   : > { %4178 = vst [vmem:[#allocation77_spill] sm:$0xff] %v2864_v44 }
  0xf2   : > { %766 = vrot.lane.b32.xlu2 %v2843_v30, %s2310_s17  ;;  %764 = vrot.lane.b32.xlu1 %v2840_v61, %s2310_s17  ;;  %v2885_v61 = vld [vmem:[%s2345_s14 + $0x168] sm:$0xff]  ;;  %v2888_v30 = vld [vmem:[%s2345_s14 + $0x150] sm:$0xff] }
  0xf3   : > { %762 = vrot.lane.b32.xlu0 %v2846_v62, %s2310_s17  ;;  %v2882_v62 = vld [vmem:[%s2345_s14 + $0x158] sm:$0xff]  ;;  %4184 = vst [vmem:[#allocation83_spill] sm:$0xff] %v2885_v61 }
  0xf4   : > { %v2854_v60 = vpop.permute.xlu2 %636  ;;  %v2856_v35 = vpop.permute.xlu1 %616  ;;  %4183 = vst [vmem:[#allocation82_spill] sm:$0xff] %v2882_v62 }
  0xf5   : > { %4174 = vst [vmem:[#allocation73_spill] sm:$0xff] %v2854_v60  ;;  %v2858_v54 = vpop.permute.xlu0 %614 }
  0xf6   : > { %4175 = vst [vmem:[#allocation74_spill] sm:$0xff] %v2856_v35 }
  0xf7   : > { %4176 = vst [vmem:[#allocation75_spill] sm:$0xff] %v2858_v54 }
  0xfa   : > { %772 = vrot.lane.b32.xlu2 %v2864_v44, %s2310_s17  ;;  %770 = vrot.lane.b32.xlu1 %v2861_v55, %s2310_s17  ;;  %v2067_v44 = vld [vmem:[%s2345_s14 + $0x188] sm:$0xff] }
  0xfb   : > { %768 = vrot.lane.b32.xlu0 %v2867_v49, %s2310_s17  ;;  %v2907_v49 = vld [vmem:[%s2345_s14 + $0x170] sm:$0xff] }
  0xfc   : > { %v2875_v35 = vpop.permute.xlu2 %642  ;;  %v2877_v54 = vpop.permute.xlu1 %622 }
  0xfd   : > { %4180 = vst [vmem:[#allocation79_spill] sm:$0xff] %v2875_v35  ;;  %v2879_v60 = vpop.permute.xlu0 %620  ;;  %v2904_v35 = vld [vmem:[%s2345_s14 + $0x180] sm:$0xff] }
  0xfe   : > { %4181 = vst [vmem:[#allocation80_spill] sm:$0xff] %v2877_v54 }
  0xff   : > { %4182 = vst [vmem:[#allocation81_spill] sm:$0xff] %v2879_v60 }
 0x100   : > { %4187 = vst [vmem:[#allocation86_spill] sm:$0xff] %v2904_v35 }
 0x102   : > { %778 = vrot.lane.b32.xlu2 %v2885_v61, %s2310_s17  ;;  %776 = vrot.lane.b32.xlu1 %v2882_v62, %s2310_s17 }
 0x103   : > { %774 = vrot.lane.b32.xlu0 %v2888_v30, %s2310_s17 }
 0x104   : > { %v2896_v55 = vpop.permute.xlu2 %648  ;;  %v2898_v54 = vpop.permute.xlu1 %628 }
 0x105   : > { %4185 = vst [vmem:[#allocation84_spill] sm:$0xff] %v2898_v54  ;;  %v2900_v60 = vpop.permute.xlu0 %626 }
 0x106   : > { %4186 = vst [vmem:[#allocation85_spill] sm:$0xff] %v2900_v60 }
 0x10a   : > { %784 = vrot.lane.b32.xlu2 %v2067_v44, %s2310_s17  ;;  %782 = vrot.lane.b32.xlu1 %v2904_v35, %s2310_s17 }
 0x10b   : > { %780 = vrot.lane.b32.xlu0 %v2907_v49, %s2310_s17 }
 0x10c   : > { %v2914_v62 = vpop.permute.xlu2 %654  ;;  %v2916_v61 = vpop.permute.xlu1 %634 }
 0x10d   : > { %v2918_v54 = vpop.permute.xlu0 %632 }
 0x112   : > { %854 = vrot.lane.b32.xlu2 %v2348_v0, %s2311_s18  ;;  %852 = vrot.lane.b32.xlu1 %v2363_v4, %s2311_s18 }
 0x113   : > { %850 = vrot.lane.b32.xlu0 %v2351_v1, %s2311_s18 }
 0x114   : > { %v2926_v44 = vpop.permute.xlu2 %724  ;;  %v2928_v35 = vpop.permute.xlu1 %640 }
 0x115   : > { %v2930_v60 = vpop.permute.xlu0 %638 }
 0x11a   : > { %860 = vrot.lane.b32.xlu2 %v2375_v7, %s2311_s18  ;;  %858 = vrot.lane.b32.xlu1 %v2378_v8, %s2311_s18 }
 0x11b   : > { %856 = vrot.lane.b32.xlu0 %v2360_v3, %s2311_s18 }
 0x11c   : > { %v2938_v0 = vpop.permute.xlu2 %730  ;;  %v2940_v4 = vpop.permute.xlu1 %646 }
 0x11d   : > { %v2942_v1 = vpop.permute.xlu0 %644 }
 0x122   : > { %866 = vrot.lane.b32.xlu2 %v2390_v10, %s2311_s18  ;;  %864 = vrot.lane.b32.xlu1 %v2393_v11, %s2311_s18 }
 0x123   : > { %862 = vrot.lane.b32.xlu0 %v2372_v6, %s2311_s18 }
 0x124   : > { %v2950_v7 = vpop.permute.xlu2 %736  ;;  %v2952_v8 = vpop.permute.xlu1 %652 }
 0x125   : > { %v2954_v3 = vpop.permute.xlu0 %650 }
 0x126   : > { %4188 = vst [vmem:[#allocation87_spill] sm:$0xff] %v2954_v3 }
 0x12a   : > { %872 = vrot.lane.b32.xlu2 %v2405_v13, %s2311_s18  ;;  %870 = vrot.lane.b32.xlu1 %v2408_v14, %s2311_s18 }
 0x12b   : > { %868 = vrot.lane.b32.xlu0 %v2387_v9, %s2311_s18 }
 0x12c   : > { %v2962_v10 = vpop.permute.xlu2 %742  ;;  %v2964_v11 = vpop.permute.xlu1 %722 }
 0x12d   : > { %4189 = vst [vmem:[#allocation88_spill] sm:$0xff] %v2962_v10  ;;  %v2966_v6 = vpop.permute.xlu0 %656 }
 0x12e   : > { %4190 = vst [vmem:[#allocation89_spill] sm:$0xff] %v2964_v11  ;;  %v3044_v11 = vld [vmem:[%s2345_s14 + $0x181] sm:$0xff] }
 0x12f   : > { %4199 = vst [vmem:[#allocation98_spill] sm:$0xff] %v3044_v11 }
 0x132   : > { %878 = vrot.lane.b32.xlu2 %v2420_v16, %s2311_s18  ;;  %876 = vrot.lane.b32.xlu1 %v2423_v17, %s2311_s18 }
 0x133   : > { %874 = vrot.lane.b32.xlu0 %v2402_v12, %s2311_s18 }
 0x134   : > { %v2974_v13 = vpop.permute.xlu2 %748  ;;  %v2976_v14 = vpop.permute.xlu1 %728 }
 0x135   : > { %v2978_v9 = vpop.permute.xlu0 %726 }
 0x13a   : > { %884 = vrot.lane.b32.xlu2 %v2435_v19, %s2311_s18  ;;  %882 = vrot.lane.b32.xlu1 %v2438_v20, %s2311_s18 }
 0x13b   : > { %880 = vrot.lane.b32.xlu0 %v2417_v15, %s2311_s18 }
 0x13c   : > { %v2986_v16 = vpop.permute.xlu2 %754  ;;  %v2988_v17 = vpop.permute.xlu1 %734 }
 0x13d   : > { %4191 = vst [vmem:[#allocation90_spill] sm:$0xff] %v2988_v17  ;;  %v2990_v12 = vpop.permute.xlu0 %732  ;;  %v4219_v17 = vld [vmem:[#allocation9_spill] sm:$0xff] }
 0x13e   : > { %4192 = vst [vmem:[#allocation91_spill] sm:$0xff] %v2990_v12  ;;  %v2136_v12 = vld [vmem:[%s2345_s14 + $0x60] sm:$0xff] }
 0x142   : > { %890 = vrot.lane.b32.xlu2 %v2450_v22, %s2311_s18  ;;  %888 = vrot.lane.b32.xlu1 %v2453_v23, %s2311_s18 }
 0x143   : > { %886 = vrot.lane.b32.xlu0 %v2432_v18, %s2311_s18 }
 0x144   : > { %v2998_v19 = vpop.permute.xlu2 %760  ;;  %v3000_v20 = vpop.permute.xlu1 %740 }
 0x145   : > { %4193 = vst [vmem:[#allocation92_spill] sm:$0xff] %v3000_v20  ;;  %v3002_v15 = vpop.permute.xlu0 %738  ;;  %v2133_v20 = vld [vmem:[%s2345_s14 + $0x38] sm:$0xff] }
 0x146   : > { %4194 = vst [vmem:[#allocation93_spill] sm:$0xff] %v3002_v15  ;;  %v3041_v15 = vld [vmem:[%s2345_s14 + $0x189] sm:$0xff] }
 0x147   : > { %4198 = vst [vmem:[#allocation97_spill] sm:$0xff] %v3041_v15 }
 0x14a   : > { %896 = vrot.lane.b32.xlu2 %v2465_v25, %s2311_s18  ;;  %894 = vrot.lane.b32.xlu1 %v2468_v26, %s2311_s18 }
 0x14b   : > { %892 = vrot.lane.b32.xlu0 %v2447_v21, %s2311_s18 }
 0x14c   : > { %v3010_v22 = vpop.permute.xlu2 %766  ;;  %v3012_v18 = vpop.permute.xlu1 %746 }
 0x14d   : > { %4195 = vst [vmem:[#allocation94_spill] sm:$0xff] %v3012_v18  ;;  %v3014_v23 = vpop.permute.xlu0 %744 }
 0x14e   : > { %4196 = vst [vmem:[#allocation95_spill] sm:$0xff] %v3014_v23  ;;  %v3165_v23 = vld [vmem:[%s2345_s14 + $0x182] sm:$0xff] }
 0x152   : > { %902 = vrot.lane.b32.xlu2 %v2480_v28, %s2311_s18  ;;  %900 = vrot.lane.b32.xlu1 %v2483_v29, %s2311_s18 }
 0x153   : > { %898 = vrot.lane.b32.xlu0 %v2462_v24, %s2311_s18 }
 0x154   : > { %v3022_v25 = vpop.permute.xlu2 %772  ;;  %v3024_v21 = vpop.permute.xlu1 %752 }
 0x155   : > { %v3026_v26 = vpop.permute.xlu0 %750 }
 0x15a   : > { %908 = vrot.lane.b32.xlu2 %v2493_v31, %s2311_s18  ;;  %906 = vrot.lane.b32.xlu1 %v2496_v32, %s2311_s18 }
 0x15b   : > { %904 = vrot.lane.b32.xlu0 %v2477_v27, %s2311_s18 }
 0x15c   : > { %v3034_v28 = vpop.permute.xlu2 %778  ;;  %v3036_v29 = vpop.permute.xlu1 %758 }
 0x15d   : > { %4197 = vst [vmem:[#allocation96_spill] sm:$0xff] %v3034_v28  ;;  %v3038_v24 = vpop.permute.xlu0 %756  ;;  %v4223_v28 = vld [vmem:[#allocation78_spill] sm:$0xff] }
 0x162   : > { %978 = vrot.lane.b32.xlu2 %v2507_v34, %s2312_s19  ;;  %912 = vrot.lane.b32.xlu1 %v3041_v15, %s2311_s18 }
 0x163   : > { %910 = vrot.lane.b32.xlu0 %v3044_v11, %s2311_s18 }
 0x164   : > { %v3052_v27 = vpop.permute.xlu2 %784  ;;  %v3054_v31 = vpop.permute.xlu1 %764 }
 0x165   : > { %v3056_v32 = vpop.permute.xlu0 %762 }
 0x16a   : > { %984 = vrot.lane.b32.xlu2 %v2521_v38, %s2312_s19  ;;  %982 = vrot.lane.b32.xlu1 %v2524_v39, %s2312_s19 }
 0x16b   : > { %980 = vrot.lane.b32.xlu0 %v2504_v33, %s2312_s19 }
 0x16c   : > { %v3064_v34 = vpop.permute.xlu2 %854  ;;  %v3066_v15 = vpop.permute.xlu1 %770 }
 0x16d   : > { %v3068_v11 = vpop.permute.xlu0 %768 }
 0x172   : > { %990 = vrot.lane.b32.xlu2 %v2538_v42, %s2312_s19  ;;  %988 = vrot.lane.b32.xlu1 %v2541_v43, %s2312_s19 }
 0x173   : > { %986 = vrot.lane.b32.xlu0 %v2518_v37, %s2312_s19 }
 0x174   : > { %v3076_v38 = vpop.permute.xlu2 %860  ;;  %v3078_v39 = vpop.permute.xlu1 %776 }
 0x175   : > { %4200 = vst [vmem:[#allocation99_spill] sm:$0xff] %v3076_v38  ;;  %v3080_v33 = vpop.permute.xlu0 %774  ;;  %v2132_v38 = vld [vmem:[%s2345_s14 + $0x30] sm:$0xff] }
 0x17a   : > { %996 = vrot.lane.b32.xlu2 %v2555_v46, %s2312_s19  ;;  %994 = vrot.lane.b32.xlu1 %v2558_v47, %s2312_s19 }
 0x17b   : > { %992 = vrot.lane.b32.xlu0 %v2535_v41, %s2312_s19 }
 0x17c   : > { %v3088_v42 = vpop.permute.xlu2 %866  ;;  %v3090_v43 = vpop.permute.xlu1 %782 }
 0x17d   : > { %4201 = vst [vmem:[#allocation100_spill] sm:$0xff] %v3088_v42  ;;  %v3092_v37 = vpop.permute.xlu0 %780 }
 0x17e   : > { %4202 = vst [vmem:[#allocation101_spill] sm:$0xff] %v3092_v37  ;;  %v4226_v37 = vld [vmem:[#allocation71_spill] sm:$0xff] }
 0x182   : > { %1002 = vrot.lane.b32.xlu2 %v2576_v52, %s2312_s19  ;;  %1000 = vrot.lane.b32.xlu1 %v2579_v53, %s2312_s19 }
 0x183   : > { %998 = vrot.lane.b32.xlu0 %v2552_v45, %s2312_s19 }
 0x184   : > { %v3100_v46 = vpop.permute.xlu2 %872  ;;  %v3102_v47 = vpop.permute.xlu1 %852 }
 0x185   : > { %4203 = vst [vmem:[#allocation102_spill] sm:$0xff] %v3100_v46  ;;  %v3104_v41 = vpop.permute.xlu0 %850 }
 0x186   : > { %4204 = vst [vmem:[#allocation103_spill] sm:$0xff] %v3104_v41 }
 0x18a   : > { %1008 = vrot.lane.b32.xlu2 %v2597_v58, %s2312_s19  ;;  %1006 = vrot.lane.b32.xlu1 %v2600_v59, %s2312_s19 }
 0x18b   : > { %1004 = vrot.lane.b32.xlu0 %v2573_v51, %s2312_s19 }
 0x18c   : > { %v3112_v52 = vpop.permute.xlu2 %878  ;;  %v3114_v53 = vpop.permute.xlu1 %858 }
 0x18d   : > { %v857_v45 = vpop.permute.xlu0 %856 }
 0x192   : > { %1014 = vrot.lane.b32.xlu2 %v2618_v2, %s2312_s19  ;;  %1012 = vrot.lane.b32.xlu1 %v2621_v5, %s2312_s19  ;;  %v4210_v5 = vld [vmem:[#allocation25_spill] sm:$0xff] }
 0x193   : > { %1010 = vrot.lane.b32.xlu0 %v2594_v57, %s2312_s19  ;;  %4213 = vst [vmem:[#allocation25_spill] sm:$0xff] %v3165_v23 }
 0x194   : > { %v3122_v58 = vpop.permute.xlu2 %884  ;;  %v3124_v59 = vpop.permute.xlu1 %864 }
 0x195   : > { %4205 = vst [vmem:[#allocation104_spill] sm:$0xff] %v3124_v59  ;;  %v3126_v42 = vpop.permute.xlu0 %862  ;;  %v4225_v59 = vld [vmem:[#allocation41_spill] sm:$0xff] }
 0x196   : > { %4206 = vst [vmem:[#allocation105_spill] sm:$0xff] %v3126_v42  ;;  %v3182_v42 = vld [vmem:[%s2345_s14 + $0x18a] sm:$0xff]  ;;  %v1483_v3 = vsel %vm1458_vm0, %v4226_v37, %v4225_v59 }
 0x19a   : > { %1020 = vrot.lane.b32.xlu2 %v2639_v48, %s2312_s19  ;;  %1018 = vrot.lane.b32.xlu1 %v2642_v40, %s2312_s19 }
 0x19b   : > { %1016 = vrot.lane.b32.xlu0 %v2615_v63, %s2312_s19 }
 0x19c   : > { %v3134_v51 = vpop.permute.xlu2 %890  ;;  %v3136_v2 = vpop.permute.xlu1 %870 }
 0x19d   : > { %4207 = vst [vmem:[#allocation106_spill] sm:$0xff] %v3136_v2  ;;  %v3138_v57 = vpop.permute.xlu0 %868  ;;  %v4220_v2 = vld [vmem:[#allocation32_spill] sm:$0xff] }
 0x19e   : > { %4208 = vst [vmem:[#allocation107_spill] sm:$0xff] %v3138_v57  ;;  %v1462_v10 = vsel %vm1458_vm0, %v4220_v2, %v4219_v17 }
 0x1a2   : > { %1026 = vrot.lane.b32.xlu2 %v2660_v36, %s2312_s19  ;;  %1024 = vrot.lane.b32.xlu1 %v2663_v56, %s2312_s19  ;;  %v4211_v36 = vld [vmem:[#allocation26_spill] sm:$0xff]  ;;  %v4212_v56 = vld [vmem:[#allocation20_spill] sm:$0xff] }
 0x1a3   : > { %1022 = vrot.lane.b32.xlu0 %v2636_v50, %s2312_s19  ;;  %4217 = vst [vmem:[#allocation20_spill] sm:$0xff] %v3182_v42 }
 0x1a4   : > { %v3146_v40 = vpop.permute.xlu2 %896  ;;  %v3148_v48 = vpop.permute.xlu1 %876 }
 0x1a5   : > { %v3150_v63 = vpop.permute.xlu0 %874 }
 0x1a6   : > { %4209 = vst [vmem:[#allocation108_spill] sm:$0xff] %v3150_v63  ;;  %v4214_v63 = vld [vmem:[#allocation30_spill] sm:$0xff] }
 0x1aa   : > { %1032 = vrot.lane.b32.xlu2 %v4210_v5, %s2312_s19  ;;  %1030 = vrot.lane.b32.xlu1 %v4211_v36, %s2312_s19  ;;  %v4215_v5 = vld [vmem:[#allocation24_spill] sm:$0xff] }
 0x1ab   : > { %1028 = vrot.lane.b32.xlu0 %v4212_v56, %s2312_s19 }
 0x1ac   : > { %v3158_v41 = vpop.permute.xlu2 %902  ;;  %v3160_v50 = vpop.permute.xlu1 %882 }
 0x1ad   : > { %v3162_v46 = vpop.permute.xlu0 %880 }
 0x1b2   : > { %1038 = vrot.lane.b32.xlu2 %v3165_v23, %s2312_s19  ;;  %1036 = vrot.lane.b32.xlu1 %v4214_v63, %s2312_s19 }
 0x1b3   : > { %1034 = vrot.lane.b32.xlu0 %v4215_v5, %s2312_s19 }
 0x1b4   : > { %v3173_v18 = vpop.permute.xlu2 %908  ;;  %v3175_v56 = vpop.permute.xlu1 %888 }
 0x1b5   : > { %4216 = vst [vmem:[#allocation26_spill] sm:$0xff] %v3173_v18  ;;  %v3177_v57 = vpop.permute.xlu0 %886  ;;  %v4221_v18 = vld [vmem:[#allocation39_spill] sm:$0xff] }
 0x1ba   : > { %1108 = vrot.lane.b32.xlu2 %v2133_v20, %s2313_s20  ;;  %1106 = vrot.lane.b32.xlu1 %v2132_v38, %s2313_s20  ;;  %v1495_v20 = vsel %vm1491_vm1, %v1462_v10, %v4221_v18  ;;  %v4222_v38 = vld [vmem:[#allocation40_spill] sm:$0xff]  ;;  %v4227_v18 = vld [vmem:[#allocation37_spill] sm:$0xff] }
 0x1bb   : > { %1040 = vrot.lane.b32.xlu0 %v3182_v42, %s2312_s19  ;;  %v1484_v42 = vsel %vm1458_vm0, %v4223_v28, %v4222_v38  ;;  %v1528_v10 = vsel %vm1524_vm2, %v1495_v20, %v2976_v14  ;;  %v4228_v28 = vld [vmem:[#allocation79_spill] sm:$0xff] }
 0x1bc   : > { %v3188_v63 = vpop.permute.xlu2 %978  ;;  %v3190_v5 = vpop.permute.xlu1 %894  ;;  %v1517_v17 = vsel %vm1491_vm1, %v1484_v42, %v2942_v1  ;;  %v1561_v38 = vsel %vm1557_vm3, %v1528_v10, %v857_v45  ;;  %v4230_v45 = vld [vmem:[#allocation48_spill] sm:$0xff]  ;;  %v4232_v10 = vld [vmem:[#allocation77_spill] sm:$0xff] }
 0x1bd   : > { %4218 = vst [vmem:[#allocation30_spill] sm:$0xff] %v3188_v63  ;;  %v3192_v23 = vpop.permute.xlu0 %892  ;;  %v4224_v63 = vld [vmem:[#allocation43_spill] sm:$0xff]  ;;  %v1550_v2 = vsel %vm1524_vm2, %v1517_v17, %v3022_v25  ;;  %v2139_v25 = vld [vmem:[%s2345_s14 + $0x80] sm:$0xff] }
 0x1be   : > { %v4231_v17 = vld [vmem:[#allocation46_spill] sm:$0xff] }
 0x1c2   : > { %1114 = vrot.lane.b32.xlu2 %v2136_v12, %s2313_s20  ;;  %1112 = vrot.lane.b32.xlu1 %v4224_v63, %s2313_s20  ;;  %v1516_v12 = vsel %vm1491_vm1, %v1483_v3, %v4228_v28  ;;  %v4233_v28 = vld [vmem:[#allocation42_spill] sm:$0xff] }
 0x1c3   : > { %1110 = vrot.lane.b32.xlu0 %v4227_v18, %s2313_s20  ;;  %v1549_v1 = vsel %vm1524_vm2, %v1516_v12, %v3066_v15  ;;  %v1486_v15 = vsel %vm1458_vm0, %v4232_v10, %v4231_v17  ;;  %v4254_v18 = vld [vmem:[#allocation70_spill] sm:$0xff] }
 0x1c4   : > { %v985_v37 = vpop.permute.xlu2 %984  ;;  %v901_v59 = vpop.permute.xlu1 %900  ;;  %v1519_v12 = vsel %vm1491_vm1, %v1486_v15, %v2896_v55  ;;  %v4236_v55 = vld [vmem:[#allocation54_spill] sm:$0xff]  ;;  %v4237_v15 = vld [vmem:[#allocation47_spill] sm:$0xff] }
 0x1c5   : > { %v3223_v14 = vsel %vm1590_vm4, %v1561_v38, %v985_v37  ;;  %v3226_v42 = vsel %vm1557_vm3, %v1550_v2, %v901_v59  ;;  %v899_v20 = vpop.permute.xlu0 %898  ;;  %v1552_v37 = vsel %vm1524_vm2, %v1519_v12, %v3078_v39 }
 0x1c6   : > { %4229 = vst [vmem:[#allocation24_spill] sm:$0xff] %v3223_v14  ;;  %v3229_v3 = vsel %vm1557_vm3, %v1549_v1, %v899_v20  ;;  %v2142_v20 = vld [vmem:[%s2345_s14 + $0xa8] sm:$0xff] }
 0x1ca   : > { %1120 = vrot.lane.b32.xlu2 %v2139_v25, %s2313_s20  ;;  %1118 = vrot.lane.b32.xlu1 %v4230_v45, %s2313_s20  ;;  %v4235_v25 = vld [vmem:[#allocation50_spill] sm:$0xff] }
 0x1cb   : > { %1116 = vrot.lane.b32.xlu0 %v4233_v28, %s2313_s20  ;;  %v1490_v17 = vsel %vm1458_vm0, %v2907_v49, %v4235_v25  ;;  %v4240_v25 = vld [vmem:[#allocation31_spill] sm:$0xff] }
 0x1cc   : > { %v3242_v2 = vpop.permute.xlu2 %990  ;;  %v3244_v38 = vpop.permute.xlu1 %906  ;;  %v1523_v10 = vsel %vm1491_vm1, %v1490_v17, %v2966_v6  ;;  %v4241_v17 = vld [vmem:[#allocation56_spill] sm:$0xff] }
 0x1cd   : > { %4234 = vst [vmem:[#allocation9_spill] sm:$0xff] %v3242_v2  ;;  %v905_v59 = vpop.permute.xlu0 %904  ;;  %v1556_v39 = vsel %vm1524_vm2, %v1523_v10, %v3052_v27  ;;  %v4242_v27 = vld [vmem:[#allocation60_spill] sm:$0xff] }
 0x1ce   : > { %v3249_v1 = vsel %vm1557_vm3, %v1552_v37, %v905_v59  ;;  %v2145_v59 = vld [vmem:[%s2345_s14 + $0xc8] sm:$0xff] }
 0x1d2   : > { %1126 = vrot.lane.b32.xlu2 %v2142_v20, %s2313_s20  ;;  %1124 = vrot.lane.b32.xlu1 %v4236_v55, %s2313_s20  ;;  %v4239_v20 = vld [vmem:[#allocation6_spill] sm:$0xff] }
 0x1d3   : > { %1122 = vrot.lane.b32.xlu0 %v4237_v15, %s2313_s20  ;;  %v1461_v6 = vsel %vm1458_vm0, %v4240_v25, %v4239_v20 }
 0x1d4   : > { %v3264_v28 = vpop.permute.xlu2 %996  ;;  %v913_v12 = vpop.permute.xlu1 %912  ;;  %v1494_v15 = vsel %vm1491_vm1, %v1461_v6, %v4241_v17  ;;  %v4246_v17 = vld [vmem:[#allocation23_spill] sm:$0xff] }
 0x1d5   : > { %4238 = vst [vmem:[#allocation32_spill] sm:$0xff] %v3264_v28  ;;  %v3267_v49 = vsel %vm1557_vm3, %v1556_v39, %v913_v12  ;;  %v3269_v37 = vpop.permute.xlu0 %910  ;;  %v1527_v10 = vsel %vm1524_vm2, %v1494_v15, %v2978_v9  ;;  %v4243_v39 = vld [vmem:[#allocation53_spill] sm:$0xff] }
 0x1d6   : > { %v1560_v12 = vsel %vm1557_vm3, %v1527_v10, %v3064_v34  ;;  %v1474_v2 = vsel %vm1458_vm0, %v4243_v39, %v4246_v17  ;;  %v4247_v9 = vld [vmem:[#allocation61_spill] sm:$0xff]  ;;  %v4248_v34 = vld [vmem:[#allocation66_spill] sm:$0xff] }
 0x1d7   : > { %v1507_v15 = vsel %vm1491_vm1, %v1474_v2, %v4247_v9  ;;  %v4252_v17 = vld [vmem:[#allocation29_spill] sm:$0xff]  ;;  %v4253_v9 = vld [vmem:[#allocation67_spill] sm:$0xff] }
 0x1d8   : > { %v1540_v10 = vsel %vm1524_vm2, %v1507_v15, %v3024_v21 }
 0x1da   : > { %1132 = vrot.lane.b32.xlu2 %v2145_v59, %s2313_s20  ;;  %1130 = vrot.lane.b32.xlu1 %v4242_v27, %s2313_s20  ;;  %v2148_v59 = vld [vmem:[%s2345_s14 + $0xf0] sm:$0xff] }
 0x1db   : > { %1128 = vrot.lane.b32.xlu0 %v4243_v39, %s2313_s20 }
 0x1dc   : > { %v3286_v28 = vpop.permute.xlu2 %1002  ;;  %v983_v20 = vpop.permute.xlu1 %982 }
 0x1dd   : > { %4244 = vst [vmem:[#allocation39_spill] sm:$0xff] %v3286_v28  ;;  %v3289_v25 = vsel %vm1590_vm4, %v1560_v12, %v983_v20  ;;  %v3291_v6 = vpop.permute.xlu0 %980  ;;  %v4249_v12 = vld [vmem:[#allocation59_spill] sm:$0xff]  ;;  %v1573_v20 = vsel %vm1557_vm3, %v1540_v10, %v3162_v46  ;;  %v4255_v46 = vld [vmem:[#allocation72_spill] sm:$0xff] }
 0x1de   : > { %4245 = vst [vmem:[#allocation40_spill] sm:$0xff] %v3289_v25  ;;  %v1477_v21 = vsel %vm1458_vm0, %v4249_v12, %v4252_v17  ;;  %v4259_v25 = vld [vmem:[#allocation35_spill] sm:$0xff] }
 0x1df   : > { %v1510_v15 = vsel %vm1491_vm1, %v1477_v21, %v4253_v9  ;;  %v2188_v9 = vld [vmem:[%s2345_s14 + $0x151] sm:$0xff] }
 0x1e0   : > { %v1543_v10 = vsel %vm1524_vm2, %v1510_v15, %v3036_v29  ;;  %v4260_v15 = vld [vmem:[#allocation73_spill] sm:$0xff] }
 0x1e2   : > { %1138 = vrot.lane.b32.xlu2 %v2148_v59, %s2313_s20  ;;  %1136 = vrot.lane.b32.xlu1 %v4248_v34, %s2313_s20 }
 0x1e3   : > { %1134 = vrot.lane.b32.xlu0 %v4249_v12, %s2313_s20 }
 0x1e4   : > { %v1009_v28 = vpop.permute.xlu2 %1008  ;;  %v3308_v39 = vpop.permute.xlu1 %988 }
 0x1e5   : > { %4250 = vst [vmem:[#allocation78_spill] sm:$0xff] %v3308_v39  ;;  %v3311_v2 = vsel %vm1590_vm4, %v1573_v20, %v1009_v28  ;;  %v3313_v59 = vpop.permute.xlu0 %986  ;;  %v4256_v28 = vld [vmem:[#allocation65_spill] sm:$0xff]  ;;  %v1576_v20 = vsel %vm1557_vm3, %v1543_v10, %v3177_v57 }
 0x1e6   : > { %4251 = vst [vmem:[#allocation43_spill] sm:$0xff] %v3311_v2  ;;  %v2180_v39 = vld [vmem:[%s2345_s14 + $0xf1] sm:$0xff]  ;;  %v1480_v29 = vsel %vm1458_vm0, %v4256_v28, %v4259_v25 }
 0x1e7   : > { %v1513_v14 = vsel %vm1491_vm1, %v1480_v29, %v4260_v15  ;;  %v2212_v29 = vld [vmem:[%s2345_s14 + $0xf2] sm:$0xff] }
 0x1e8   : > { %v1546_v57 = vsel %vm1524_vm2, %v1513_v14, %v3054_v31  ;;  %v4262_v15 = vld [vmem:[#allocation52_spill] sm:$0xff]  ;;  %v4263_v14 = vld [vmem:[#allocation18_spill] sm:$0xff] }
 0x1ea   : > { %1144 = vrot.lane.b32.xlu2 %v4254_v18, %s2313_s20  ;;  %1142 = vrot.lane.b32.xlu1 %v4255_v46, %s2313_s20 }
 0x1eb   : > { %1140 = vrot.lane.b32.xlu0 %v4256_v28, %s2313_s20 }
 0x1ec   : > { %v1015_v2 = vpop.permute.xlu2 %1014  ;;  %v3330_v12 = vpop.permute.xlu1 %994 }
 0x1ed   : > { %4257 = vst [vmem:[#allocation41_spill] sm:$0xff] %v3330_v12  ;;  %v3333_v17 = vsel %vm1590_vm4, %v1576_v20, %v1015_v2  ;;  %v3335_v21 = vpop.permute.xlu0 %992  ;;  %v1579_v2 = vsel %vm1557_vm3, %v1546_v57, %v3192_v23  ;;  %v4264_v12 = vld [vmem:[#allocation80_spill] sm:$0xff]  ;;  %v4265_v57 = vld [vmem:[#allocation81_spill] sm:$0xff] }
 0x1ee   : > { %4258 = vst [vmem:[#allocation71_spill] sm:$0xff] %v3333_v17  ;;  %v1472_v17 = vsel %vm1458_vm0, %v4236_v55, %v4263_v14  ;;  %v2172_v14 = vld [vmem:[%s2345_s14 + $0x91] sm:$0xff] }
 0x1f2   : > { %1282 = vrot.lane.b32.xlu2 %v2188_v9, %s2314_s21  ;;  %1266 = vrot.lane.b32.xlu1 %v2180_v39, %s2314_s21  ;;  %v2164_v9 = vld [vmem:[%s2345_s14 + $0x31] sm:$0xff] }
 0x1f3   : > { %1154 = vrot.lane.b32.xlu0 %v2888_v30, %s2313_s20  ;;  %v4261_v39 = vld [vmem:[#allocation8_spill] sm:$0xff] }
 0x1f4   : > { %v1021_v10 = vpop.permute.xlu2 %1020  ;;  %v3352_v20 = vpop.permute.xlu1 %1000  ;;  %v1473_v31 = vsel %vm1458_vm0, %v4262_v15, %v4261_v39 }
 0x1f5   : > { %v3355_v25 = vsel %vm1590_vm4, %v1579_v2, %v1021_v10  ;;  %v3357_v28 = vpop.permute.xlu0 %998  ;;  %v1506_v23 = vsel %vm1491_vm1, %v1473_v31, %v4264_v12  ;;  %v1505_v2 = vsel %vm1491_vm1, %v1472_v17, %v4265_v57  ;;  %v2157_v31 = vld [vmem:[%s2345_s14 + $0x158] sm:$0xff] }
 0x1f6   : > { %v1539_v10 = vsel %vm1524_vm2, %v1506_v23, %v3026_v26  ;;  %v1538_v55 = vsel %vm1524_vm2, %v1505_v2, %v2974_v13  ;;  %v2196_v13 = vld [vmem:[%s2345_s14 + $0x32] sm:$0xff]  ;;  %v4267_v23 = vld [vmem:[#allocation58_spill] sm:$0xff] }
 0x1f7   : > { %v1572_v12 = vsel %vm1557_vm3, %v1539_v10, %v3112_v52  ;;  %v1571_v15 = vsel %vm1557_vm3, %v1538_v55, %v3148_v48  ;;  %v4266_v52 = vld [vmem:[#allocation11_spill] sm:$0xff]  ;;  %v4268_v2 = vld [vmem:[#allocation22_spill] sm:$0xff]  ;;  %v4270_v55 = vld [vmem:[#allocation85_spill] sm:$0xff] }
 0x1f8   : > { %v1476_v57 = vsel %vm1458_vm0, %v4267_v23, %v4266_v52  ;;  %v1475_v48 = vsel %vm1458_vm0, %v4242_v27, %v4268_v2  ;;  %v2181_v23 = vld [vmem:[%s2345_s14 + $0xf9] sm:$0xff]  ;;  %v4272_v2 = vld [vmem:[#allocation64_spill] sm:$0xff] }
 0x1fa   : > { %1234 = vrot.lane.b32.xlu2 %v2164_v9, %s2314_s21  ;;  %1410 = vrot.lane.b32.xlu1 %v4211_v36, %s2315_s22 }
 0x1fb   : > { %1394 = vrot.lane.b32.xlu0 %v2212_v29, %s2315_s22 }
 0x1fc   : > { %v1027_v9 = vpop.permute.xlu2 %1026  ;;  %v1007_v39 = vpop.permute.xlu1 %1006 }
 0x1fd   : > { %v3385_v36 = vsel %vm1590_vm4, %v3229_v3, %v1027_v9  ;;  %v3388_v17 = vsel %vm1590_vm4, %v1572_v12, %v1007_v39  ;;  %v1005_v26 = vpop.permute.xlu0 %1004  ;;  %v4269_v3 = vld [vmem:[#allocation84_spill] sm:$0xff]  ;;  %v1508_v12 = vsel %vm1491_vm1, %v1475_v48, %v4270_v55 }
 0x1fe   : > { %v3391_v29 = vsel %vm1590_vm4, %v1571_v15, %v1005_v26  ;;  %v1509_v10 = vsel %vm1491_vm1, %v1476_v57, %v4269_v3  ;;  %v1541_v27 = vsel %vm1524_vm2, %v1508_v12, %v2986_v16  ;;  %v2189_v16 = vld [vmem:[%s2345_s14 + $0x159] sm:$0xff]  ;;  %v4273_v3 = vld [vmem:[#allocation51_spill] sm:$0xff] }
 0x1ff   : > { %v1542_v9 = vsel %vm1524_vm2, %v1509_v10, %v3038_v24  ;;  %v2204_v57 = vld [vmem:[%s2345_s14 + $0x92] sm:$0xff] }
 0x200   : > { %v1575_v39 = vsel %vm1557_vm3, %v1542_v9, %v3122_v58  ;;  %v4271_v58 = vld [vmem:[#allocation14_spill] sm:$0xff]  ;;  %v4275_v10 = vld [vmem:[#allocation28_spill] sm:$0xff] }
 0x201   : > { %v1479_v48 = vsel %vm1458_vm0, %v4272_v2, %v4271_v58  ;;  %v1478_v55 = vsel %vm1458_vm0, %v4248_v34, %v4275_v10  ;;  %v2213_v58 = vld [vmem:[%s2345_s14 + $0xfa] sm:$0xff] }
 0x202   : > { %1362 = vrot.lane.b32.xlu2 %v2196_v13, %s2315_s22  ;;  %1156 = vrot.lane.b32.xlu1 %v2157_v31, %s2313_s20  ;;  %v1574_v13 = vsel %vm1557_vm3, %v1541_v27, %v3160_v50  ;;  %v4274_v50 = vld [vmem:[#allocation83_spill] sm:$0xff]  ;;  %v1512_v9 = vsel %vm1491_vm1, %v1479_v48, %v2916_v61  ;;  %v1511_v27 = vsel %vm1491_vm1, %v1478_v55, %v2918_v54  ;;  %v4277_v2 = vld [vmem:[#allocation17_spill] sm:$0xff] }
 0x203   : > { %1250 = vrot.lane.b32.xlu0 %v2172_v14, %s2314_s21  ;;  %v1544_v61 = vsel %vm1524_vm2, %v1511_v27, %v2998_v19  ;;  %v4278_v48 = vld [vmem:[#allocation57_spill] sm:$0xff] }
 0x204   : > { %v1033_v15 = vpop.permute.xlu2 %1032  ;;  %v1013_v26 = vpop.permute.xlu1 %1012 }
 0x205   : > { %v3419_v31 = vsel %vm1590_vm4, %v3249_v1, %v1033_v15  ;;  %v3422_v52 = vsel %vm1590_vm4, %v1575_v39, %v1013_v26  ;;  %v1011_v24 = vpop.permute.xlu0 %1010  ;;  %v1489_v1 = vsel %vm1458_vm0, %v4274_v50, %v4273_v3  ;;  %v1545_v39 = vsel %vm1524_vm2, %v1512_v9, %v3056_v32 }
 0x206   : > { %v3425_v14 = vsel %vm1590_vm4, %v1574_v13, %v1011_v24  ;;  %v1522_v12 = vsel %vm1491_vm1, %v1489_v1, %v2914_v62  ;;  %v1578_v62 = vsel %vm1557_vm3, %v1545_v39, %v3134_v51  ;;  %v145_v13 = vld [vmem:[%s2345_s14 + $0x8] sm:$0xff]  ;;  %v1577_v32 = vsel %vm1557_vm3, %v1544_v61, %v3175_v56  ;;  %v2165_v51 = vld [vmem:[%s2345_s14 + $0x39] sm:$0xff] }
 0x207   : > { %v1555_v34 = vsel %vm1524_vm2, %v1522_v12, %v3090_v43  ;;  %v1482_v56 = vsel %vm1458_vm0, %v4254_v18, %v4277_v2  ;;  %v4279_v1 = vld [vmem:[#allocation34_spill] sm:$0xff] }
 0x208   : > { %v1588_v15 = vsel %vm1557_vm3, %v1555_v34, %v3269_v37  ;;  %v1481_v10 = vsel %vm1458_vm0, %v4255_v46, %v4279_v1  ;;  %v1515_v12 = vsel %vm1491_vm1, %v1482_v56, %v2928_v35  ;;  %v4285_v1 = vld [vmem:[#allocation12_spill] sm:$0xff] }
 0x209   : > { %v1514_v18 = vsel %vm1491_vm1, %v1481_v10, %v2930_v60  ;;  %v1548_v9 = vsel %vm1524_vm2, %v1515_v12, %v3068_v11  ;;  %v4286_v10 = vld [vmem:[#allocation27_spill] sm:$0xff] }
 0x20a   : > { %1284 = vrot.lane.b32.xlu2 %v2189_v16, %s2314_s21  ;;  %1268 = vrot.lane.b32.xlu1 %v2181_v23, %s2314_s21  ;;  %v2221_v23 = vld [vmem:[%s2345_s14 + $0x15a] sm:$0xff]  ;;  %v1547_v35 = vsel %vm1524_vm2, %v1514_v18, %v3010_v22 }
 0x20b   : > { %1378 = vrot.lane.b32.xlu0 %v2204_v57, %s2315_s22  ;;  %v4276_v57 = vld [vmem:[#allocation10_spill] sm:$0xff]  ;;  %v1580_v34 = vsel %vm1557_vm3, %v1547_v35, %v3190_v5  ;;  %v4288_v18 = vld [vmem:[#allocation69_spill] sm:$0xff] }
 0x20c   : > { %v1039_v54 = vpop.permute.xlu2 %1038  ;;  %v1019_v26 = vpop.permute.xlu1 %1018  ;;  %v1460_v37 = vsel %vm1458_vm0, %v145_v13, %v4276_v57  ;;  %v4283_v13 = vld [vmem:[#allocation76_spill] sm:$0xff] }
 0x20d   : > { %v3462_v43 = vsel %vm1590_vm4, %v1588_v15, %v1039_v54  ;;  %v3465_v24 = vsel %vm1590_vm4, %v1578_v62, %v1019_v26  ;;  %v1017_v16 = vpop.permute.xlu0 %1016  ;;  %v1493_v3 = vsel %vm1491_vm1, %v1460_v37, %v4278_v48  ;;  %v2197_v62 = vld [vmem:[%s2345_s14 + $0x3a] sm:$0xff]  ;;  %v2190_v48 = vld [vmem:[%s2345_s14 + $0x169] sm:$0xff] }
 0x20e   : > { %v3468_v19 = vsel %vm1590_vm4, %v1577_v32, %v1017_v16  ;;  %v1526_v55 = vsel %vm1524_vm2, %v1493_v3, %v2926_v44  ;;  %v1581_v44 = vsel %vm1557_vm3, %v1548_v9, %v3146_v40  ;;  %v4280_v40 = vld [vmem:[#allocation2_spill] sm:$0xff]  ;;  %v4282_v26 = vld [vmem:[#allocation21_spill] sm:$0xff]  ;;  %v4284_v32 = vld [vmem:[#allocation63_spill] sm:$0xff] }
 0x20f   : > { %v1559_v46 = vsel %vm1557_vm3, %v1526_v55, %v3102_v47  ;;  %v4281_v15 = vld [vmem:[#allocation38_spill] sm:$0xff]  ;;  %v1485_v5 = vsel %vm1458_vm0, %v4283_v13, %v4282_v26  ;;  %v2182_v3 = vld [vmem:[%s2345_s14 + $0x109] sm:$0xff] }
 0x210   : > { %v1592_v27 = vsel %vm1590_vm4, %v1559_v46, %v3291_v6  ;;  %v1463_v6 = vsel %vm1458_vm0, %v4281_v15, %v4280_v40  ;;  %v2173_v54 = vld [vmem:[%s2345_s14 + $0x99] sm:$0xff] }
 0x211   : > { %v1496_v16 = vsel %vm1491_vm1, %v1463_v6, %v4284_v32  ;;  %v4287_v55 = vld [vmem:[#allocation82_spill] sm:$0xff]  ;;  %v4289_v46 = vld [vmem:[#allocation45_spill] sm:$0xff] }
 0x212   : > { %1236 = vrot.lane.b32.xlu2 %v2165_v51, %s2314_s21  ;;  %1412 = vrot.lane.b32.xlu1 %v2221_v23, %s2315_s22  ;;  %v1529_v51 = vsel %vm1524_vm2, %v1496_v16, %v2938_v0  ;;  %v1518_v23 = vsel %vm1491_vm1, %v1485_v5, %v2940_v4  ;;  %v1488_v12 = vsel %vm1458_vm0, %v4287_v55, %v4286_v10  ;;  %v2166_v16 = vld [vmem:[%s2345_s14 + $0x49] sm:$0xff] }
 0x213   : > { %1396 = vrot.lane.b32.xlu0 %v2213_v58, %s2315_s22  ;;  %v1551_v57 = vsel %vm1524_vm2, %v1518_v23, %v3080_v33  ;;  %v1562_v37 = vsel %vm1557_vm3, %v1529_v51, %v3114_v53  ;;  %v1487_v35 = vsel %vm1458_vm0, %v2888_v30, %v4289_v46  ;;  %v2222_v51 = vld [vmem:[%s2345_s14 + $0x16a] sm:$0xff] }
 0x214   : > { %v1109_v39 = vpop.permute.xlu2 %1108  ;;  %v1025_v60 = vpop.permute.xlu1 %1024  ;;  %v1584_v0 = vsel %vm1557_vm3, %v1551_v57, %v3158_v41  ;;  %v1595_v4 = vsel %vm1590_vm4, %v1562_v37, %v3313_v59  ;;  %v1466_v41 = vsel %vm1458_vm0, %v4224_v63, %v4285_v1  ;;  %v2205_v59 = vld [vmem:[%s2345_s14 + $0x9a] sm:$0xff]  ;;  %v4290_v63 = vld [vmem:[#allocation87_spill] sm:$0xff]  ;;  %v2159_v10 = vld [vmem:[%s2345_s14 + $0x170] sm:$0xff] }
 0x215   : > { %v3505_v11 = vsel %vm1623_vm5, %v1592_v27, %v1109_v39  ;;  %v3508_v47 = vsel %vm1590_vm4, %v1581_v44, %v1025_v60  ;;  %v1023_v61 = vpop.permute.xlu0 %1022  ;;  %v1499_v9 = vsel %vm1491_vm1, %v1466_v41, %v4288_v18  ;;  %v1521_v44 = vsel %vm1491_vm1, %v1488_v12, %v2952_v8  ;;  %v4291_v39 = vld [vmem:[#allocation101_spill] sm:$0xff]  ;;  %v4295_v23 = vld [vmem:[#allocation15_spill] sm:$0xff] }
 0x216   : > { %v3511_v22 = vsel %vm1590_vm4, %v1580_v34, %v1023_v61  ;;  %v1520_v27 = vsel %vm1491_vm1, %v1487_v35, %v4290_v63  ;;  %v1554_v60 = vsel %vm1524_vm2, %v1521_v44, %v4291_v39  ;;  %v4292_v34 = vld [vmem:[#allocation104_spill] sm:$0xff]  ;;  %v4294_v61 = vld [vmem:[#allocation26_spill] sm:$0xff]  ;;  %v4296_v57 = vld [vmem:[#allocation75_spill] sm:$0xff] }
 0x217   : > { %v2174_v55 = vld [vmem:[%s2345_s14 + $0xa9] sm:$0xff]  ;;  %v1726_v35 = vld [vmem:[%s4052_s1 + $0x20] sm:$0xf]  ;;  %v2191_v63 = vld [vmem:[%s2345_s14 + $0x171] sm:$0xff] }
 0x218   : > { %2228 = vmatpush.msk.msra.mxu0 %vm1824_vm6, %v1726_v35  ;;  %2265 = vmatpush.msk.msra.mxu2 %vm1824_vm6, %v1726_v35  ;;  %v4301_v39 = vld [vmem:[#allocation13_spill] sm:$0xff] }
 0x219   : > { %2266 = vmatpush.msk.msra.mxu3 %vm1824_vm6, %v1726_v35  ;;  %2264 = vmatpush.msk.msra.mxu1 %vm1824_vm6, %v1726_v35  ;;  %v4313_v35 = vld [vmem:[#allocation16_spill] sm:$0xff] }
 0x21a   : > { %1364 = vrot.lane.b32.xlu2 %v2197_v62, %s2315_s22  ;;  %1158 = vrot.lane.b32.xlu1 %v4274_v50, %s2313_s20  ;;  %v1587_v62 = vsel %vm1557_vm3, %v1554_v60, %v4294_v61  ;;  %v4302_v60 = vld [vmem:[#allocation37_spill] sm:$0xff]  ;;  %v4304_v61 = vld [vmem:[#allocation36_spill] sm:$0xff] }
 0x21b   : > { %1252 = vrot.lane.b32.xlu0 %v2173_v54, %s2314_s21 }
 0x21c   : > { %v1115_v58 = vpop.permute.xlu2 %1114  ;;  %v1031_v2 = vpop.permute.xlu1 %1030 }
 0x21d   : > { %v3540_v56 = vsel %vm1623_vm5, %v1595_v4, %v1115_v58  ;;  %v3543_v50 = vsel %vm1590_vm4, %v1584_v0, %v1031_v2  ;;  %v1029_v33 = vpop.permute.xlu0 %1028  ;;  %v4297_v0 = vld [vmem:[#allocation88_spill] sm:$0xff]  ;;  %v4298_v58 = vld [vmem:[#allocation106_spill] sm:$0xff] }
 0x21e   : > { %v3547_v53 = vsel %vm1590_vm4, %v3226_v42, %v1029_v33  ;;  %v1532_v42 = vsel %vm1524_vm2, %v1499_v9, %v2950_v7  ;;  %v4293_v7 = vld [vmem:[#allocation96_spill] sm:$0xff] }
 0x21f   : > { %v1565_v30 = vsel %vm1557_vm3, %v1532_v42, %v4292_v34  ;;  %v1553_v8 = vsel %vm1524_vm2, %v1520_v27, %v4293_v7  ;;  %v4300_v42 = vld [vmem:[#allocation40_spill] sm:$0xff]  ;;  %v1465_v34 = vsel %vm1458_vm0, %v4302_v60, %v4301_v39 }
 0x220   : > { %v1598_v40 = vsel %vm1590_vm4, %v1565_v30, %v3335_v21  ;;  %v1586_v54 = vsel %vm1557_vm3, %v1553_v8, %v3244_v38  ;;  %v1469_v21 = vsel %vm1458_vm0, %v4230_v45, %v4295_v23  ;;  %v2214_v38 = vld [vmem:[%s2345_s14 + $0x10a] sm:$0xff] }
 0x221   : > { %v1502_v37 = vsel %vm1491_vm1, %v1469_v21, %v4296_v57  ;;  %v2183_v27 = vld [vmem:[%s2345_s14 + $0x111] sm:$0xff]  ;;  %v4303_v8 = vld [vmem:[#allocation3_spill] sm:$0xff] }
 0x222   : > { %1286 = vrot.lane.b32.xlu2 %v2190_v48, %s2314_s21  ;;  %1270 = vrot.lane.b32.xlu1 %v2182_v3, %s2314_s21  ;;  %v1535_v4 = vsel %vm1524_vm2, %v1502_v37, %v4297_v0  ;;  %v2206_v30 = vld [vmem:[%s2345_s14 + $0xaa] sm:$0xff]  ;;  %v4309_v21 = vld [vmem:[#allocation105_spill] sm:$0xff] }
 0x223   : > { %1380 = vrot.lane.b32.xlu0 %v2205_v59, %s2315_s22  ;;  %v1568_v2 = vsel %vm1557_vm3, %v1535_v4, %v4298_v58  ;;  %v2198_v59 = vld [vmem:[%s2345_s14 + $0x4a] sm:$0xff]  ;;  %v4311_v4 = vld [vmem:[#allocation9_spill] sm:$0xff] }
 0x224   : > { %v1121_v15 = vpop.permute.xlu2 %1120  ;;  %v1037_v6 = vpop.permute.xlu1 %1036  ;;  %v1601_v45 = vsel %vm1590_vm4, %v1568_v2, %v3357_v28  ;;  %v1724_v7 = vld [vmem:[%s4052_s1 + $0x10] sm:$0xff]  ;;  %v1723_v57 = vld [vmem:[%s4052_s1 + $0x8] sm:$0xff] }
 0x225   : > { %v3585_v26 = vsel %vm1623_vm5, %v1598_v40, %v1121_v15  ;;  %v3588_v13 = vsel %vm1590_vm4, %v1587_v62, %v1037_v6  ;;  %v1035_v5 = vpop.permute.xlu0 %1034  ;;  %v1464_v62 = vsel %vm1458_vm0, %v4304_v61, %v4303_v8  ;;  %v4305_v40 = vld [vmem:[#allocation44_spill] sm:$0xff]  ;;  %v4306_v6 = vld [vmem:[#allocation62_spill] sm:$0xff]  ;;  %v4310_v37 = vld [vmem:[#allocation99_spill] sm:$0xff] }
 0x226   : > { %v3591_v32 = vsel %vm1590_vm4, %v1586_v54, %v1035_v5  ;;  %v1498_v15 = vsel %vm1491_vm1, %v1465_v34, %v4305_v40  ;;  %v1497_v54 = vsel %vm1491_vm1, %v1464_v62, %v4306_v6  ;;  %v4307_v5 = vld [vmem:[#allocation90_spill] sm:$0xff]  ;;  %v4315_v39 = vld [vmem:[#allocation92_spill] sm:$0xff]  ;;  %v4316_v34 = vld [vmem:[#allocation107_spill] sm:$0xff] }
 0x22a   : > { %1238 = vrot.lane.b32.xlu2 %v2166_v16, %s2314_s21  ;;  %1414 = vrot.lane.b32.xlu1 %v2222_v51, %s2315_s22  ;;  %v1531_v16 = vsel %vm1524_vm2, %v1498_v15, %v4307_v5  ;;  %v4308_v51 = vld [vmem:[#allocation91_spill] sm:$0xff]  ;;  %v2297_v5 = vld [vmem:[%s2345_s14 + $0x90] sm:$0xff] }
 0x22b   : > { %1398 = vrot.lane.b32.xlu0 %v2214_v38, %s2315_s22  ;;  %v1530_v23 = vsel %vm1524_vm2, %v1497_v54, %v4308_v51  ;;  %v1564_v38 = vsel %vm1557_vm3, %v1531_v16, %v4309_v21  ;;  %v2152_v54 = vld [vmem:[%s2345_s14 + $0x120] sm:$0xff]  ;;  %v4318_v16 = vld [vmem:[#allocation19_spill] sm:$0xff] }
 0x22c   : > { %v1127_v33 = vpop.permute.xlu2 %1126  ;;  %v3610_v48 = vpop.permute.xlu1 %1106  ;;  %v1563_v0 = vsel %vm1557_vm3, %v1530_v23, %v4310_v37  ;;  %v1597_v58 = vsel %vm1590_vm4, %v1564_v38, %v4311_v4  ;;  %v1471_v51 = vsel %vm1458_vm0, %v2297_v5, %v4318_v16  ;;  %v2175_v23 = vld [vmem:[%s2345_s14 + $0xb1] sm:$0xff]  ;;  %v2298_v21 = vld [vmem:[%s2345_s14 + $0x80] sm:$0xff]  ;;  %v4320_v37 = vld [vmem:[#allocation55_spill] sm:$0xff] }
 0x22d   : > { %v3613_v3 = vsel %vm1623_vm5, %v1601_v45, %v1127_v33  ;;  %v1041_v1 = vpop.permute.xlu0 %1040  ;;  %v4312_v33 = vld [vmem:[#allocation78_spill] sm:$0xff]  ;;  %v4319_v38 = vld [vmem:[#allocation5_spill] sm:$0xff] }
 0x22e   : > { %v3617_v41 = vsel %vm1590_vm4, %v3267_v49, %v1041_v1  ;;  %v4299_v49 = vld [vmem:[#allocation24_spill] sm:$0xff]  ;;  %v1596_v1 = vsel %vm1590_vm4, %v1563_v0, %v4312_v33  ;;  %v1504_v0 = vsel %vm1491_vm1, %v1471_v51, %v4320_v37  ;;  %v4323_v33 = vld [vmem:[#allocation86_spill] sm:$0xff]  ;;  %v4329_v51 = vld [vmem:[#allocation7_spill] sm:$0xff] }
 0x22f   : > { %v2216_v37 = vld [vmem:[%s2345_s14 + $0x122] sm:$0xff] }
 0x232   : > { %1366 = vrot.lane.b32.xlu2 %v2198_v59, %s2315_s22  ;;  %1160 = vrot.lane.b32.xlu1 %v2159_v10, %s2313_s20 }
 0x233   : > { %1254 = vrot.lane.b32.xlu0 %v2174_v55, %s2314_s21  ;;  %v1722_v55 = vld [vmem:[%s4052_s1] sm:$0xff] }
 0x234   : > { %v1133_v28 = vpop.permute.xlu2 %1132  ;;  %v1113_v12 = vpop.permute.xlu1 %1112 }
 0x235   : > { %v3627_v18 = vsel %vm1623_vm5, %v3391_v29, %v1133_v28  ;;  %v3631_v9 = vsel %vm1623_vm5, %v4299_v49, %v1113_v12  ;;  %v1111_v46 = vpop.permute.xlu0 %1110  ;;  %v1725_v29 = vld [vmem:[%s4052_s1 + $0x18] sm:$0xff] }
 0x236   : > { %v3638_v44 = vsel %vm1623_vm5, %v4300_v42, %v1111_v46  ;;  %1840 = vmatpush.msra.mxu0 %v1725_v29  ;;  %2268 = vmatpush.msra.mxu2 %v1725_v29  ;;  %v2167_v12 = vld [vmem:[%s2345_s14 + $0x51] sm:$0xff]  ;;  %v2296_v46 = vld [vmem:[%s2345_s14 + $0x68] sm:$0xff] }
 0x237   : > { %2269 = vmatpush.msra.mxu3 %v1725_v29  ;;  %2267 = vmatpush.msra.mxu1 %v1725_v29  ;;  %v2223_v49 = vld [vmem:[%s2345_s14 + $0x172] sm:$0xff]  ;;  %v1468_v42 = vsel %vm1458_vm0, %v2296_v46, %v4313_v35  ;;  %v4327_v35 = vld [vmem:[#allocation39_spill] sm:$0xff] }
 0x238   : > { %1841 = vmatpush.msra.mxu0 %v1724_v7  ;;  %2271 = vmatpush.msra.mxu2 %v1724_v7  ;;  %v2215_v29 = vld [vmem:[%s2345_s14 + $0x112] sm:$0xff] }
 0x239   : > { %2272 = vmatpush.msra.mxu3 %v1724_v7  ;;  %2270 = vmatpush.msra.mxu1 %v1724_v7  ;;  %v4317_v7 = vld [vmem:[#allocation32_spill] sm:$0xff] }
 0x23a   : > { %1288 = vrot.lane.b32.xlu2 %v2191_v63, %s2314_s21  ;;  %1272 = vrot.lane.b32.xlu1 %v2183_v27, %s2314_s21  ;;  %v4314_v63 = vld [vmem:[#allocation49_spill] sm:$0xff] }
 0x23b   : > { %1382 = vrot.lane.b32.xlu0 %v2206_v30, %s2315_s22  ;;  %1842 = vmatpush.msra.mxu0 %v1723_v57  ;;  %v1501_v27 = vsel %vm1491_vm1, %v1468_v42, %v4314_v63 }
 0x23c   : > { %v3675_v2 = vpop.permute.xlu2 %1138  ;;  %v1119_v45 = vpop.permute.xlu1 %1118  ;;  %2274 = vmatpush.msra.mxu2 %v1723_v57  ;;  %2275 = vmatpush.msra.mxu3 %v1723_v57  ;;  %v1534_v60 = vsel %vm1524_vm2, %v1501_v27, %v4315_v39 }
 0x23d   : > { %v3680_v59 = vsel %vm1623_vm5, %v1597_v58, %v1119_v45  ;;  %v1117_v10 = vpop.permute.xlu0 %1116  ;;  %1843 = vmatpush.msra.mxu0 %v1722_v55  ;;  %2273 = vmatpush.msra.mxu1 %v1723_v57  ;;  %v1567_v30 = vsel %vm1557_vm3, %v1534_v60, %v4316_v34  ;;  %v1470_v57 = vsel %vm1458_vm0, %v2298_v21, %v4319_v38  ;;  %v4322_v58 = vld [vmem:[#allocation94_spill] sm:$0xff]  ;;  %v4330_v38 = vld [vmem:[#allocation33_spill] sm:$0xff] }
 0x23e   : > { %v3686_v28 = vsel %vm1623_vm5, %v1596_v1, %v1117_v10  ;;  %2277 = vmatpush.msra.mxu2 %v1722_v55  ;;  %2278 = vmatpush.msra.mxu3 %v1722_v55  ;;  %v1600_v8 = vsel %vm1590_vm4, %v1567_v30, %v4317_v7  ;;  %v1537_v45 = vsel %vm1524_vm2, %v1504_v0, %v4322_v58  ;;  %v4324_v1 = vld [vmem:[#allocation95_spill] sm:$0xff]  ;;  %v2207_v7 = vld [vmem:[%s2345_s14 + $0xb2] sm:$0xff] }
 0x23f   : > { %2276 = vmatpush.msra.mxu1 %v1722_v55  ;;  %v4325_v55 = vld [vmem:[#allocation108_spill] sm:$0xff]  ;;  %v2184_v30 = vld [vmem:[%s2345_s14 + $0x121] sm:$0xff]  ;;  %v4331_v0 = vld [vmem:[#allocation89_spill] sm:$0xff] }
 0x242   : > { %1240 = vrot.lane.b32.xlu2 %v2167_v12, %s2314_s21  ;;  %1416 = vrot.lane.b32.xlu1 %v2223_v49, %s2315_s22  ;;  %v1570_v12 = vsel %vm1557_vm3, %v1537_v45, %v4325_v55  ;;  %v4326_v49 = vld [vmem:[#allocation102_spill] sm:$0xff] }
 0x243   : > { %1400 = vrot.lane.b32.xlu0 %v2215_v29, %s2315_s22  ;;  %v1603_v42 = vsel %vm1590_vm4, %v1570_v12, %v4327_v35  ;;  %v4333_v45 = vld [vmem:[#allocation30_spill] sm:$0xff] }
 0x244   : > { %v1145_v61 = vpop.permute.xlu2 %1144  ;;  %v1125_v62 = vpop.permute.xlu1 %1124 }
 0x245   : > { %v3707_v40 = vsel %vm1623_vm5, %v3468_v19, %v1145_v61  ;;  %v3710_v15 = vsel %vm1623_vm5, %v1600_v8, %v1125_v62  ;;  %v3712_v6 = vpop.permute.xlu0 %1122  ;;  %v4321_v19 = vld [vmem:[#allocation74_spill] sm:$0xff]  ;;  %v2199_v8 = vld [vmem:[%s2345_s14 + $0x52] sm:$0xff] }
 0x246   : > { %v1503_v4 = vsel %vm1491_vm1, %v1470_v57, %v4321_v19  ;;  %v144_v61 = vld [vmem:[%s2345_s14] sm:$0xff] }
 0x247   : > { %v1536_v10 = vsel %vm1524_vm2, %v1503_v4, %v4324_v1  ;;  %v4332_v4 = vld [vmem:[#allocation103_spill] sm:$0xff] }
 0x248   : > { %v1569_v46 = vsel %vm1557_vm3, %v1536_v10, %v4326_v49  ;;  %v4335_v10 = vld [vmem:[#allocation98_spill] sm:$0xff] }
 0x249   : > { %v1602_v27 = vsel %vm1590_vm4, %v1569_v46, %v3352_v20 }
 0x24a   : > { %1162 = vrot.lane.b32.xlu2 %v4323_v33, %s2313_s20  ;;  %1146 = vrot.lane.b32.xlu1 %v2152_v54, %s2313_s20  ;;  %v4328_v54 = vld [vmem:[#allocation43_spill] sm:$0xff] }
 0x24b   : > { %1256 = vrot.lane.b32.xlu0 %v2175_v23, %s2314_s21  ;;  %v1459_v23 = vsel %vm1458_vm0, %v144_v61, %v4329_v51  ;;  %v2161_v61 = vld [vmem:[%s2345_s14 + $0x188] sm:$0xff] }
 0x24c   : > { %v1283_v29 = vpop.permute.xlu2 %1282  ;;  %v1131_v63 = vpop.permute.xlu1 %1130  ;;  %v1492_v57 = vsel %vm1491_vm1, %v1459_v23, %v4330_v38 }
 0x24d   : > { %v3743_v39 = vsel %vm1623_vm5, %v1603_v42, %v1131_v63  ;;  %v1129_v60 = vpop.permute.xlu0 %1128  ;;  %v1525_v19 = vsel %vm1524_vm2, %v1492_v57, %v4331_v0  ;;  %v2153_v42 = vld [vmem:[%s2345_s14 + $0x128] sm:$0xff] }
 0x24e   : > { %v3746_v34 = vsel %vm1623_vm5, %v1602_v27, %v1129_v60  ;;  %v1558_v58 = vsel %vm1557_vm3, %v1525_v19, %v4332_v4  ;;  %v2168_v63 = vld [vmem:[%s2345_s14 + $0x61] sm:$0xff] }
 0x24f   : > { %v1591_v33 = vsel %vm1590_vm4, %v1558_v58, %v4333_v45  ;;  %v2299_v45 = vld [vmem:[%s2345_s14 + $0x60] sm:$0xff] }
 0x250   : > { %v1624_v1 = vsel %vm1623_vm5, %v1591_v33, %v3610_v48  ;;  %v2176_v48 = vld [vmem:[%s2345_s14 + $0xc1] sm:$0xff]  ;;  %v4337_v33 = vld [vmem:[#allocation4_spill] sm:$0xff] }
 0x252   : > { %1274 = vrot.lane.b32.xlu2 %v2184_v30, %s2314_s21  ;;  %1384 = vrot.lane.b32.xlu1 %v2207_v7, %s2315_s22  ;;  %v2208_v7 = vld [vmem:[%s2345_s14 + $0xc2] sm:$0xff] }
 0x253   : > { %1368 = vrot.lane.b32.xlu0 %v2199_v8, %s2315_s22  ;;  %v2200_v8 = vld [vmem:[%s2345_s14 + $0x62] sm:$0xff] }
 0x254   : > { %v1235_v62 = vpop.permute.xlu2 %1234  ;;  %v1137_v20 = vpop.permute.xlu1 %1136 }
 0x255   : > { %v3757_v5 = vsel %vm1623_vm5, %v4328_v54, %v1137_v20  ;;  %v1135_v16 = vpop.permute.xlu0 %1134  ;;  %v1657_v55 = vsel %vm1656_vm7, %v1624_v1, %v1235_v62  ;;  %v1640_v20 = vsel %vm1623_vm5, %v3425_v14, %v3675_v2  ;;  %v2185_v14 = vld [vmem:[%s2345_s14 + $0x129] sm:$0xff]  ;;  %v4336_v2 = vld [vmem:[#allocation97_spill] sm:$0xff] }
 0x256   : > { %v3763_v21 = vsel %vm1623_vm5, %v3388_v17, %v1135_v16  ;;  %v4334_v17 = vld [vmem:[#allocation25_spill] sm:$0xff]  ;;  %v2177_v1 = vld [vmem:[%s2345_s14 + $0xc9] sm:$0xff] }
 0x25a   : > { %1418 = vrot.lane.b32.xlu2 %v4334_v17, %s2315_s22  ;;  %1402 = vrot.lane.b32.xlu1 %v2216_v37, %s2315_s22  ;;  %v2217_v37 = vld [vmem:[%s2345_s14 + $0x12a] sm:$0xff]  ;;  %v1467_v17 = vsel %vm1458_vm0, %v2299_v45, %v4337_v33  ;;  %v2170_v33 = vld [vmem:[%s2345_s14 + $0x79] sm:$0xff] }
 0x25b   : > { %1290 = vrot.lane.b32.xlu0 %v4335_v10, %s2314_s21  ;;  %v2169_v10 = vld [vmem:[%s2345_s14 + $0x69] sm:$0xff] }
 0x25c   : > { %v1363_v12 = vpop.permute.xlu2 %1362  ;;  %v3782_v49 = vpop.permute.xlu1 %1142 }
 0x25d   : > { %v3784_v46 = vpop.permute.xlu0 %1140  ;;  %v1690_v35 = vsel %vm1689_vm8, %v1657_v55, %v1363_v12  ;;  %v4338_v55 = vld [vmem:[#allocation68_spill] sm:$0xff] }
 0x25e   : > { %2229 = vmatmul.msk.f32.vlgmr.msra.gmra.mxu0 %vm1727_vm9, %v1690_v35  ;;  %v1500_v12 = vsel %vm1491_vm1, %v1467_v17, %v4338_v55  ;;  %v4339_v35 = vld [vmem:[#allocation93_spill] sm:$0xff] }
 0x25f   : > { %v2226_v17 = vld [vmem:[%s2345_s14 + $0x19a] sm:$0xff] }
 0x262   : > { %1148 = vrot.lane.b32.xlu2 %v2153_v42, %s2313_s20  ;;  %1258 = vrot.lane.b32.xlu1 %v2176_v48, %s2314_s21  ;;  %v4340_v42 = vld [vmem:[#allocation100_spill] sm:$0xff] }
 0x263   : > { %1242 = vrot.lane.b32.xlu0 %v2168_v63, %s2314_s21  ;;  %v4341_v63 = vld [vmem:[#allocation41_spill] sm:$0xff] }
 0x264   : > { %v1285_v27 = vpop.permute.xlu2 %1284  ;;  %v1267_v60 = vpop.permute.xlu1 %1266 }
 0x265   : > { %v1155_v30 = vpop.permute.xlu0 %1154  ;;  %v1673_v23 = vsel %vm1656_vm7, %v1640_v20, %v1267_v60 }
 0x266   : > { %v1648_v62 = vsel %vm1623_vm5, %v3385_v36, %v1155_v30  ;;  %v4342_v30 = vld [vmem:[#allocation20_spill] sm:$0xff] }
 0x267   : > { %v1681_v51 = vsel %vm1656_vm7, %v1648_v62, %v1283_v29 }
 0x26a   : > { %1386 = vrot.lane.b32.xlu2 %v2208_v7, %s2315_s22  ;;  %1370 = vrot.lane.b32.xlu1 %v2200_v8, %s2315_s22 }
 0x26b   : > { %1164 = vrot.lane.b32.xlu0 %v2161_v61, %s2313_s20 }
 0x26c   : > { %v1237_v54 = vpop.permute.xlu2 %1236  ;;  %v1411_v16 = vpop.permute.xlu1 %1410 }
 0x26d   : > { %v1395_v38 = vpop.permute.xlu0 %1394  ;;  %v1714_v36 = vsel %vm1689_vm8, %v1681_v51, %v1411_v16  ;;  %v1658_v29 = vsel %vm1656_vm7, %v3505_v11, %v1237_v54  ;;  %v1533_v11 = vsel %vm1524_vm2, %v1500_v12, %v4339_v35  ;;  %v2201_v16 = vld [vmem:[%s2345_s14 + $0x6a] sm:$0xff]  ;;  %v2162_v51 = vld [vmem:[%s2345_s14 + $0x198] sm:$0xff] }
 0x26e   : > { %v1706_v57 = vsel %vm1689_vm8, %v1673_v23, %v1395_v38  ;;  %2253 = vmatmul.msk.f32.vlgmr.msra.gmra.mxu3 %vm1727_vm9, %v1714_v36  ;;  %v1566_v48 = vsel %vm1557_vm3, %v1533_v11, %v4340_v42  ;;  %v2154_v23 = vld [vmem:[%s2345_s14 + $0x138] sm:$0xff]  ;;  %v2163_v11 = vld [vmem:[%s2345_s14 + $0x1a0] sm:$0xff] }
 0x26f   : > { %2245 = vmatmul.msk.f32.vlgmr.msra.gmra.mxu2 %vm1727_vm9, %v1706_v57  ;;  %v1599_v60 = vsel %vm1590_vm4, %v1566_v48, %v4341_v63  ;;  %v2155_v42 = vld [vmem:[%s2345_s14 + $0x140] sm:$0xff] }
 0x270   : > { %v1632_v7 = vsel %vm1623_vm5, %v1599_v60, %v3712_v6  ;;  %v1641_v6 = vsel %vm1623_vm5, %v3422_v52, %v3784_v46  ;;  %v2186_v52 = vld [vmem:[%s2345_s14 + $0x139] sm:$0xff]  ;;  %v2209_v46 = vld [vmem:[%s2345_s14 + $0xca] sm:$0xff] }
 0x271   : > { %v2178_v48 = vld [vmem:[%s2345_s14 + $0xd9] sm:$0xff] }
 0x272   : > { %1404 = vrot.lane.b32.xlu2 %v2217_v37, %s2315_s22  ;;  %1292 = vrot.lane.b32.xlu1 %v4336_v2, %s2314_s21 }
 0x273   : > { %1276 = vrot.lane.b32.xlu0 %v2185_v14, %s2314_s21 }
 0x274   : > { %v1365_v0 = vpop.permute.xlu2 %1364  ;;  %v1157_v19 = vpop.permute.xlu1 %1156 }
 0x275   : > { %v1251_v4 = vpop.permute.xlu0 %1250  ;;  %v1691_v58 = vsel %vm1689_vm8, %v1658_v29, %v1365_v0  ;;  %v1649_v38 = vsel %vm1623_vm5, %v3547_v53, %v1157_v19  ;;  %v2194_v0 = vld [vmem:[%s2345_s14 + $0x199] sm:$0xff] }
 0x276   : > { %2230 = vmatmul.msk.f32.gmra.mxu0 %vm1727_vm9, %v1691_v58  ;;  %v1665_v62 = vsel %vm1656_vm7, %v1632_v7, %v1251_v4  ;;  %v1682_v37 = vsel %vm1656_vm7, %v1649_v38, %v1285_v27 }
 0x27a   : > { %1260 = vrot.lane.b32.xlu2 %v2177_v1, %s2314_s21  ;;  %1244 = vrot.lane.b32.xlu1 %v2169_v10, %s2314_s21  ;;  %v2218_v1 = vld [vmem:[%s2345_s14 + $0x13a] sm:$0xff] }
 0x27b   : > { %1420 = vrot.lane.b32.xlu0 %v4342_v30, %s2315_s22 }
 0x27c   : > { %v1287_v8 = vpop.permute.xlu2 %1286  ;;  %v1269_v61 = vpop.permute.xlu1 %1268 }
 0x27d   : > { %v1379_v20 = vpop.permute.xlu0 %1378  ;;  %v1674_v14 = vsel %vm1656_vm7, %v1641_v6, %v1269_v61  ;;  %v2219_v6 = vld [vmem:[%s2345_s14 + $0x142] sm:$0xff] }
 0x27e   : > { %v1698_v54 = vsel %vm1689_vm8, %v1665_v62, %v1379_v20 }
 0x27f   : > { %2237 = vmatmul.msk.f32.vlgmr.msra.gmra.mxu1 %vm1727_vm9, %v1698_v54 }
 0x282   : > { %1372 = vrot.lane.b32.xlu2 %v2201_v16, %s2315_s22  ;;  %1166 = vrot.lane.b32.xlu1 %v2162_v51, %s2313_s20  ;;  %v2210_v16 = vld [vmem:[%s2345_s14 + $0xda] sm:$0xff] }
 0x283   : > { %1150 = vrot.lane.b32.xlu0 %v2154_v23, %s2313_s20  ;;  %v2202_v51 = vld [vmem:[%s2345_s14 + $0x7a] sm:$0xff] }
 0x284   : > { %v1239_v36 = vpop.permute.xlu2 %1238  ;;  %v1413_v57 = vpop.permute.xlu1 %1412 }
 0x285   : > { %v1397_v2 = vpop.permute.xlu0 %1396  ;;  %v1715_v53 = vsel %vm1689_vm8, %v1682_v37, %v1413_v57  ;;  %v1659_v27 = vsel %vm1656_vm7, %v3638_v44, %v1239_v36  ;;  %v2227_v36 = vld [vmem:[%s2345_s14 + $0x1a2] sm:$0xff] }
 0x286   : > { %v1707_v29 = vsel %vm1689_vm8, %v1674_v14, %v1397_v2  ;;  %2254 = vmatmul.msk.f32.gmra.mxu3 %vm1727_vm9, %v1715_v53  ;;  %v2195_v57 = vld [vmem:[%s2345_s14 + $0x1a1] sm:$0xff] }
 0x287   : > { %2246 = vmatmul.msk.f32.gmra.mxu2 %vm1727_vm9, %v1707_v29  ;;  %v2179_v29 = vld [vmem:[%s2345_s14 + $0xe1] sm:$0xff] }
 0x28a   : > { %1294 = vrot.lane.b32.xlu2 %v2194_v0, %s2314_s21  ;;  %1278 = vrot.lane.b32.xlu1 %v2186_v52, %s2314_s21  ;;  %v2203_v0 = vld [vmem:[%s2345_s14 + $0x82] sm:$0xff] }
 0x28b   : > { %1388 = vrot.lane.b32.xlu0 %v2209_v46, %s2315_s22  ;;  %v2171_v46 = vld [vmem:[%s2345_s14 + $0x81] sm:$0xff] }
 0x28c   : > { %v1367_v19 = vpop.permute.xlu2 %1366  ;;  %v1159_v4 = vpop.permute.xlu1 %1158 }
 0x28d   : > { %v1253_v58 = vpop.permute.xlu0 %1252  ;;  %v1692_v45 = vsel %vm1689_vm8, %v1659_v27, %v1367_v19  ;;  %v1650_v63 = vsel %vm1623_vm5, %v3543_v50, %v1159_v4 }
 0x28e   : > { %2231 = vmatmul.msk.f32.gmra.mxu0 %vm1727_vm9, %v1692_v45  ;;  %v1666_v55 = vsel %vm1656_vm7, %v3710_v15, %v1253_v58  ;;  %v4343_v15 = vld [vmem:[#allocation71_spill] sm:$0xff]  ;;  %v1683_v61 = vsel %vm1656_vm7, %v1650_v63, %v1287_v8 }
 0x28f   : > { %v1642_v60 = vsel %vm1623_vm5, %v4343_v15, %v3782_v49  ;;  %v2187_v49 = vld [vmem:[%s2345_s14 + $0x141] sm:$0xff] }
 0x292   : > { %1246 = vrot.lane.b32.xlu2 %v2170_v33, %s2314_s21  ;;  %1422 = vrot.lane.b32.xlu1 %v2226_v17, %s2315_s22 }
 0x293   : > { %1406 = vrot.lane.b32.xlu0 %v2218_v1, %s2315_s22 }
 0x294   : > { %v1289_v44 = vpop.permute.xlu2 %1288  ;;  %v1271_v10 = vpop.permute.xlu1 %1270 }
 0x295   : > { %v1381_v12 = vpop.permute.xlu0 %1380  ;;  %v1675_v62 = vsel %vm1656_vm7, %v1642_v60, %v1271_v10 }
 0x296   : > { %v1699_v35 = vsel %vm1689_vm8, %v1666_v55, %v1381_v12 }
 0x297   : > { %2238 = vmatmul.msk.f32.gmra.mxu1 %vm1727_vm9, %v1699_v35 }
 0x29a   : > { %1168 = vrot.lane.b32.xlu2 %v2163_v11, %s2313_s20  ;;  %1152 = vrot.lane.b32.xlu1 %v2155_v42, %s2313_s20 }
 0x29b   : > { %1262 = vrot.lane.b32.xlu0 %v2178_v48, %s2314_s21 }
 0x29c   : > { %v1241_v30 = vpop.permute.xlu2 %1240  ;;  %v1415_v7 = vpop.permute.xlu1 %1414 }
 0x29d   : > { %v1399_v50 = vpop.permute.xlu0 %1398  ;;  %v1716_v20 = vsel %vm1689_vm8, %v1683_v61, %v1415_v7  ;;  %v1660_v12 = vsel %vm1656_vm7, %v3631_v9, %v1241_v30 }
 0x29e   : > { %v1708_v54 = vsel %vm1689_vm8, %v1675_v62, %v1399_v50  ;;  %2255 = vmatmul.msk.f32.gmra.mxu3 %vm1727_vm9, %v1716_v20 }
 0x29f   : > { %2247 = vmatmul.msk.f32.gmra.mxu2 %vm1727_vm9, %v1708_v54 }
 0x2a2   : > { %1390 = vrot.lane.b32.xlu1 %v2210_v16, %s2315_s22  ;;  %1280 = vrot.lane.b32.xlu2 %v2187_v49, %s2314_s21 }
 0x2a3   : > { %1374 = vrot.lane.b32.xlu0 %v2202_v51, %s2315_s22 }
 0x2a4   : > { %v1161_v8 = vpop.permute.xlu1 %1160  ;;  %v1163_v38 = vpop.permute.xlu2 %1162 }
 0x2a5   : > { %v1255_v23 = vpop.permute.xlu0 %1254  ;;  %v1651_v27 = vsel %vm1623_vm5, %v3419_v31, %v1161_v8  ;;  %v2211_v31 = vld [vmem:[%s2345_s14 + $0xe2] sm:$0xff]  ;;  %v1652_v15 = vsel %vm1623_vm5, %v3591_v32, %v1163_v38 }
 0x2a6   : > { %v1667_v14 = vsel %vm1656_vm7, %v3613_v3, %v1255_v23  ;;  %v1684_v19 = vsel %vm1656_vm7, %v1651_v27, %v1289_v44 }
 0x2aa   : > { %1408 = vrot.lane.b32.xlu1 %v2219_v6, %s2315_s22  ;;  %1424 = vrot.lane.b32.xlu2 %v2227_v36, %s2315_s22 }
 0x2ab   : > { %1296 = vrot.lane.b32.xlu0 %v2195_v57, %s2314_s21 }
 0x2ac   : > { %v1273_v37 = vpop.permute.xlu1 %1272  ;;  %v1275_v52 = vpop.permute.xlu2 %1274 }
 0x2ad   : > { %v1383_v2 = vpop.permute.xlu0 %1382  ;;  %v1676_v4 = vsel %vm1656_vm7, %v3707_v40, %v1273_v37 }
 0x2ae   : > { %v1700_v53 = vsel %vm1689_vm8, %v1667_v14, %v1383_v2 }
 0x2af   : > { %2239 = vmatmul.msk.f32.gmra.mxu1 %vm1727_vm9, %v1700_v53 }
 0x2b2   : > { %1264 = vrot.lane.b32.xlu1 %v2179_v29, %s2314_s21  ;;  %1376 = vrot.lane.b32.xlu2 %v2203_v0, %s2315_s22 }
 0x2b3   : > { %1248 = vrot.lane.b32.xlu0 %v2171_v46, %s2314_s21 }
 0x2b4   : > { %v1417_v3 = vpop.permute.xlu1 %1416  ;;  %v1419_v17 = vpop.permute.xlu2 %1418 }
 0x2b5   : > { %v1401_v58 = vpop.permute.xlu0 %1400  ;;  %v1717_v45 = vsel %vm1689_vm8, %v1684_v19, %v1417_v3 }
 0x2b6   : > { %v1709_v33 = vsel %vm1689_vm8, %v1676_v4, %v1401_v58  ;;  %2256 = vmatmul.msk.f32.gmra.mxu3 %vm1727_vm9, %v1717_v45 }
 0x2b7   : > { %2248 = vmatmul.msk.f32.gmra.mxu2 %vm1727_vm9, %v1709_v33 }
 0x2bb   : > { %1392 = vrot.lane.b32.xlu0 %v2211_v31, %s2315_s22 }
 0x2bc   : > { %v1147_v1 = vpop.permute.xlu1 %1146  ;;  %v1149_v55 = vpop.permute.xlu2 %1148 }
 0x2bd   : > { %v1257_v10 = vpop.permute.xlu0 %1256  ;;  %v1644_v48 = vsel %vm1623_vm5, %v3465_v24, %v1147_v1  ;;  %v1645_v38 = vsel %vm1623_vm5, %v3355_v25, %v1149_v55 }
 0x2be   : > { %v1668_v44 = vsel %vm1656_vm7, %v3746_v34, %v1257_v10  ;;  %v1677_v34 = vsel %vm1656_vm7, %v1644_v48, %v1275_v52 }
 0x2c4   : > { %v1385_v40 = vpop.permute.xlu1 %1384  ;;  %v1387_v30 = vpop.permute.xlu2 %1386 }
 0x2c5   : > { %v1369_v35 = vpop.permute.xlu0 %1368  ;;  %v1701_v11 = vsel %vm1689_vm8, %v1668_v44, %v1385_v40 }
 0x2c6   : > { %v1693_v42 = vsel %vm1689_vm8, %v1660_v12, %v1369_v35  ;;  %2240 = vmatmul.msk.f32.gmra.mxu1 %vm1727_vm9, %v1701_v11 }
 0x2c7   : > { %2232 = vmatmul.msk.f32.gmra.mxu0 %vm1727_vm9, %v1693_v42 }
 0x2cc   : > { %v1403_v63 = vpop.permute.xlu1 %1402  ;;  %v1405_v32 = vpop.permute.xlu2 %1404 }
 0x2cd   : > { %v1291_v9 = vpop.permute.xlu0 %1290  ;;  %v1710_v60 = vsel %vm1689_vm8, %v1677_v34, %v1403_v63 }
 0x2ce   : > { %v1685_v7 = vsel %vm1656_vm7, %v1652_v15, %v1291_v9  ;;  %2249 = vmatmul.msk.f32.gmra.mxu2 %vm1727_vm9, %v1710_v60 }
 0x2cf   : > { %v1718_v61 = vsel %vm1689_vm8, %v1685_v7, %v1419_v17 }
 0x2d0   : > { %2257 = vmatmul.msk.f32.gmra.mxu3 %vm1727_vm9, %v1718_v61 }
 0x2d4   : > { %v1259_v62 = vpop.permute.xlu1 %1258  ;;  %v1261_v8 = vpop.permute.xlu2 %1260 }
 0x2d5   : > { %v1669_v24 = vsel %vm1656_vm7, %v3743_v39, %v1259_v62  ;;  %v1243_v50 = vpop.permute.xlu0 %1242  ;;  %v1670_v58 = vsel %vm1656_vm7, %v3627_v18, %v1261_v8 }
 0x2d6   : > { %v1702_v20 = vsel %vm1689_vm8, %v1669_v24, %v1387_v30  ;;  %v1661_v16 = vsel %vm1656_vm7, %v3540_v56, %v1243_v50 }
 0x2d7   : > { %2241 = vmatmul.msk.f32.gmra.mxu1 %vm1727_vm9, %v1702_v20 }
 0x2db   : > { %v1845_v54 = vpop.f32.mrf.mxu0 }
 0x2dc   : > { %1941 = vst [vmem:[%s3956_s8] sm:$0xff] %v1845_v54  ;;  %v1371_v49 = vpop.permute.xlu1 %1370  ;;  %v1373_v56 = vpop.permute.xlu2 %1372 }
 0x2dd   : > { %v1165_v39 = vpop.permute.xlu0 %1164  ;;  %v1694_v51 = vsel %vm1689_vm8, %v1661_v16, %v1371_v49 }
 0x2de   : > { %2233 = vmatmul.msk.f32.gmra.mxu0 %vm1727_vm9, %v1694_v51  ;;  %v1653_v37 = vsel %vm1623_vm5, %v3588_v13, %v1165_v39 }
 0x2e4   : > { %v1293_v23 = vpop.permute.xlu1 %1292  ;;  %v1295_v19 = vpop.permute.xlu2 %1294 }
 0x2e5   : > { %v1277_v6 = vpop.permute.xlu0 %1276  ;;  %v1686_v2 = vsel %vm1656_vm7, %v1653_v37, %v1293_v23 }
 0x2e6   : > { %v1678_v36 = vsel %vm1656_vm7, %v1645_v38, %v1277_v6 }
 0x2e7   : > { %v1711_v57 = vsel %vm1689_vm8, %v1678_v36, %v1405_v32 }
 0x2e8   : > { %2250 = vmatmul.msk.f32.gmra.mxu2 %vm1727_vm9, %v1711_v57 }
 0x2ec   : > { %v1245_v14 = vpop.permute.xlu1 %1244  ;;  %v1247_v31 = vpop.permute.xlu2 %1246 }
 0x2ed   : > { %v1662_v25 = vsel %vm1656_vm7, %v3686_v28, %v1245_v14  ;;  %v1421_v53 = vpop.permute.xlu0 %1420  ;;  %v1663_v60 = vsel %vm1656_vm7, %v3680_v59, %v1247_v31 }
 0x2ee   : > { %v1719_v29 = vsel %vm1689_vm8, %v1686_v2, %v1421_v53  ;;  %v1695_v0 = vsel %vm1689_vm8, %v1662_v25, %v1373_v56 }
 0x2ef   : > { %2258 = vmatmul.msk.f32.gmra.mxu3 %vm1727_vm9, %v1719_v29  ;;  %2234 = vmatmul.msk.f32.gmra.mxu0 %vm1727_vm9, %v1695_v0 }
 0x2f1   : > { %v1917_v52 = vpop.f32.mrf.mxu3 }
 0x2f2   : > { %v1893_v46 = vpop.f32.mrf.mxu2  ;;  %1965 = vst [vmem:[%s3956_s8 + $0xc0] sm:$0xff] %v1917_v52 }
 0x2f3   : > { %1957 = vst [vmem:[%s3956_s8 + $0x80] sm:$0xff] %v1893_v46  ;;  %v1848_v13 = vpop.f32.mrf.mxu0 }
 0x2f4   : > { %1942 = vst [vmem:[%s3956_s8 + $0x8] sm:$0xff] %v1848_v13  ;;  %v1167_v27 = vpop.permute.xlu1 %1166  ;;  %v1169_v35 = vpop.permute.xlu2 %1168 }
 0x2f5   : > { %v1151_v3 = vpop.permute.xlu0 %1150  ;;  %v1654_v17 = vsel %vm1623_vm5, %v3462_v43, %v1167_v27  ;;  %v1655_v59 = vsel %vm1623_vm5, %v3617_v41, %v1169_v35 }
 0x2f6   : > { %v1646_v1 = vsel %vm1623_vm5, %v3511_v22, %v1151_v3  ;;  %v1687_v55 = vsel %vm1656_vm7, %v1654_v17, %v1295_v19 }
 0x2fc   : > { %v1869_v28 = vpop.f32.mrf.mxu1  ;;  %v1279_v4 = vpop.permute.xlu1 %1278 }
 0x2fd   : > { %1949 = vst [vmem:[%s3956_s8 + $0x40] sm:$0xff] %v1869_v28  ;;  %v1389_v45 = vpop.permute.xlu0 %1388  ;;  %v1679_v18 = vsel %vm1656_vm7, %v1646_v1, %v1279_v4  ;;  %v1281_v63 = vpop.permute.xlu2 %1280 }
 0x2fe   : > { %v1703_v33 = vsel %vm1689_vm8, %v1670_v58, %v1389_v45 }
 0x2ff   : > { %2242 = vmatmul.msk.f32.gmra.mxu1 %vm1727_vm9, %v1703_v33 }
 0x304   : > { %v1423_v10 = vpop.permute.xlu1 %1422 }
 0x305   : > { %v1407_v44 = vpop.permute.xlu0 %1406  ;;  %v1720_v40 = vsel %vm1689_vm8, %v1687_v55, %v1423_v10  ;;  %v1425_v62 = vpop.permute.xlu2 %1424 }
 0x306   : > { %v1712_v12 = vsel %vm1689_vm8, %v1679_v18, %v1407_v44  ;;  %2259 = vmatmul.msk.f32.gmra.mxu3 %vm1727_vm9, %v1720_v40 }
 0x307   : > { %2251 = vmatmul.msk.f32.gmra.mxu2 %vm1727_vm9, %v1712_v12 }
 0x309   : > { %v1920_v43 = vpop.f32.mrf.mxu3 }
 0x30a   : > { %v1896_v11 = vpop.f32.mrf.mxu2  ;;  %1966 = vst [vmem:[%s3956_s8 + $0xc8] sm:$0xff] %v1920_v43 }
 0x30b   : > { %1958 = vst [vmem:[%s3956_s8 + $0x88] sm:$0xff] %v1896_v11  ;;  %v1851_v22 = vpop.f32.mrf.mxu0 }
 0x30c   : > { %1943 = vst [vmem:[%s3956_s8 + $0x10] sm:$0xff] %v1851_v22  ;;  %v1153_v42 = vpop.permute.xlu1 %1152 }
 0x30d   : > { %v1263_v48 = vpop.permute.xlu0 %1262  ;;  %v1377_v39 = vpop.permute.xlu2 %1376 }
 0x30e   : > { %v1671_v34 = vsel %vm1656_vm7, %v3763_v21, %v1263_v48  ;;  %v1647_v21 = vsel %vm1623_vm5, %v3508_v47, %v1153_v42 }
 0x30f   : > { %v1680_v24 = vsel %vm1656_vm7, %v1647_v21, %v1281_v63 }
 0x314   : > { %v1872_v15 = vpop.f32.mrf.mxu1  ;;  %v1391_v9 = vpop.permute.xlu1 %1390 }
 0x315   : > { %1950 = vst [vmem:[%s3956_s8 + $0x48] sm:$0xff] %v1872_v15  ;;  %v1375_v30 = vpop.permute.xlu0 %1374  ;;  %v1704_v7 = vsel %vm1689_vm8, %v1671_v34, %v1391_v9 }
 0x316   : > { %v1696_v61 = vsel %vm1689_vm8, %v1663_v60, %v1375_v30  ;;  %2243 = vmatmul.msk.f32.gmra.mxu1 %vm1727_vm9, %v1704_v7 }
 0x317   : > { %2235 = vmatmul.msk.f32.gmra.mxu0 %vm1727_vm9, %v1696_v61 }
 0x31c   : > { %v1409_v50 = vpop.permute.xlu1 %1408 }
 0x31d   : > { %v1297_v20 = vpop.permute.xlu0 %1296  ;;  %v1713_v32 = vsel %vm1689_vm8, %v1680_v24, %v1409_v50 }
 0x31e   : > { %v1688_v54 = vsel %vm1656_vm7, %v1655_v59, %v1297_v20  ;;  %2252 = vmatmul.msk.f32.gmra.mxu2 %vm1727_vm9, %v1713_v32 }
 0x31f   : > { %v1721_v16 = vsel %vm1689_vm8, %v1688_v54, %v1425_v62 }
 0x320   : > { %2260 = vmatmul.msk.f32.gmra.mxu3 %vm1727_vm9, %v1721_v16 }
 0x321   : > { %v1923_v47 = vpop.f32.mrf.mxu3 }
 0x322   : > { %v1899_v49 = vpop.f32.mrf.mxu2  ;;  %1967 = vst [vmem:[%s3956_s8 + $0xd0] sm:$0xff] %v1923_v47 }
 0x323   : > { %1959 = vst [vmem:[%s3956_s8 + $0x90] sm:$0xff] %v1899_v49 }
 0x324   : > { %v1265_v23 = vpop.permute.xlu1 %1264 }
 0x325   : > { %v1249_v41 = vpop.permute.xlu0 %1248  ;;  %v1672_v6 = vsel %vm1656_vm7, %v3757_v5, %v1265_v23 }
 0x326   : > { %v1664_v51 = vsel %vm1656_vm7, %v3585_v26, %v1249_v41 }
 0x327   : > { %v1697_v8 = vsel %vm1689_vm8, %v1664_v51, %v1377_v39 }
 0x328   : > { %2236 = vmatmul.msk.f32.gmra.mxu0 %vm1727_vm9, %v1697_v8 }
 0x32c   : > { %v1875_v38 = vpop.f32.mrf.mxu1 }
 0x32d   : > { %1951 = vst [vmem:[%s3956_s8 + $0x50] sm:$0xff] %v1875_v38  ;;  %v1393_v36 = vpop.permute.xlu0 %1392 }
 0x32e   : > { %v1705_v57 = vsel %vm1689_vm8, %v1672_v6, %v1393_v36 }
 0x32f   : > { %2244 = vmatmul.msk.f32.gmra.mxu1 %vm1727_vm9, %v1705_v57 }
 0x339   : > { %v1926_v26 = vpop.f32.mrf.mxu3 }
 0x33a   : > { %v1902_v56 = vpop.f32.mrf.mxu2  ;;  %1968 = vst [vmem:[%s3956_s8 + $0xd8] sm:$0xff] %v1926_v26 }
 0x33b   : > { %1960 = vst [vmem:[%s3956_s8 + $0x98] sm:$0xff] %v1902_v56 }
 0x343   : > { %v1878_v37 = vpop.f32.mrf.mxu1 }
 0x344   : > { %v1854_v14 = vpop.f32.mrf.mxu0  ;;  %1952 = vst [vmem:[%s3956_s8 + $0x58] sm:$0xff] %v1878_v37 }
 0x345   : > { %1944 = vst [vmem:[%s3956_s8 + $0x18] sm:$0xff] %v1854_v14 }
 0x351   : > { %v1905_v5 = vpop.f32.mrf.mxu2 }
 0x352   : > { %1961 = vst [vmem:[%s3956_s8 + $0xa0] sm:$0xff] %v1905_v5 }
 0x353   : > { %v1929_v2 = vpop.f32.mrf.mxu3 }
 0x354   : > { %1969 = vst [vmem:[%s3956_s8 + $0xe0] sm:$0xff] %v1929_v2  ;;  %v1881_v25 = vpop.f32.mrf.mxu1 }
 0x355   : > { %1953 = vst [vmem:[%s3956_s8 + $0x60] sm:$0xff] %v1881_v25 }
 0x35b   : > { %v1857_v53 = vpop.f32.mrf.mxu0 }
 0x35c   : > { %1945 = vst [vmem:[%s3956_s8 + $0x20] sm:$0xff] %v1857_v53 }
 0x36b   : > { %v1908_v29 = vpop.f32.mrf.mxu2 }
 0x36c   : > { %1962 = vst [vmem:[%s3956_s8 + $0xa8] sm:$0xff] %v1908_v29  ;;  %v1860_v0 = vpop.f32.mrf.mxu0 }
 0x36d   : > { %1946 = vst [vmem:[%s3956_s8 + $0x28] sm:$0xff] %v1860_v0 }
 0x372   : > { %v1932_v52 = vpop.f32.mrf.mxu3 }
 0x373   : > { %1970 = vst [vmem:[%s3956_s8 + $0xe8] sm:$0xff] %v1932_v52 }
 0x37c   : > { %v1884_v46 = vpop.f32.mrf.mxu1 }
 0x37d   : > { %1954 = vst [vmem:[%s3956_s8 + $0x68] sm:$0xff] %v1884_v46 }
 0x389   : > { %v1935_v13 = vpop.f32.mrf.mxu3 }
 0x38a   : > { %v1911_v27 = vpop.f32.mrf.mxu2  ;;  %1971 = vst [vmem:[%s3956_s8 + $0xf0] sm:$0xff] %v1935_v13 }
 0x38b   : > { %1963 = vst [vmem:[%s3956_s8 + $0xb0] sm:$0xff] %v1911_v27 }
 0x393   : > { %v1887_v3 = vpop.f32.mrf.mxu1 }
 0x394   : > { %v1863_v19 = vpop.f32.mrf.mxu0  ;;  %1955 = vst [vmem:[%s3956_s8 + $0x70] sm:$0xff] %v1887_v3 }
 0x395   : > { %1947 = vst [vmem:[%s3956_s8 + $0x30] sm:$0xff] %v1863_v19 }
 0x3a1   : > { %v1914_v28 = vpop.f32.mrf.mxu2 }
 0x3a2   : > { %1964 = vst [vmem:[%s3956_s8 + $0xb8] sm:$0xff] %v1914_v28 }
 0x3a3   : > { %v1938_v4 = vpop.f32.mrf.mxu3 }
 0x3a4   : > { %1972 = vst [vmem:[%s3956_s8 + $0xf8] sm:$0xff] %v1938_v4 }
 0x3a5   : > { %v1866_v58 = vpop.f32.mrf.mxu0 }
 0x3a6   : > { %1948 = vst [vmem:[%s3956_s8 + $0x38] sm:$0xff] %v1866_v58 }
 0x3ac   : > { %v1890_v45 = vpop.f32.mrf.mxu1 }
 0x3ad   : > { %1956 = vst [vmem:[%s3956_s8 + $0x78] sm:$0xff] %v1890_v45 }
 0x3ae PF: > { %s12_s9 = sadd.s32 1, %s2306_s9  }
 0x3af   : > { %p9_p4 = scmp.ge.s32.totalorder %s12_s9, 4  }
 0x3b1   :  { %11 = sbr.rel (!%p9_p4) target bundleno = 1 (0x1), region = 60 }

</bundles_post_ra>
